<compile_context>
chip_gen: v5e
topology: v5e:2x2
jax: 0.10.0
libtpu: 0.0.40
codegen_flags: <defaults>
</compile_context>

<pallas_src>
import jax
import jax.numpy as jnp
import numpy as np
from jax.experimental import pallas as pl
from jax.experimental.pallas import tpu as pltpu

BN_EPS = 1e-5
K1_PAD = 32  # layer-1 im2col contraction dim padded 27 -> 32


def _out_hw(s):
    # output spatial size for k=3, stride=2, pad=1
    return (s + 2 * 1 - 3) // 2 + 1


def fused_conv_model_kernel(p1_ref, w1_ref, w2_ref, w3_ref, w4_ref,
                            g_ref, b_ref, g2_ref, g3_ref, g4_ref, o_ref):
    def relu_bn(y, layer):
        y = jnp.maximum(y, 0.0)                                          # ReLU
        m = y.shape[0]
        mean = jnp.sum(y, axis=0, keepdims=True) * (1.0 / m)             # stats over N*Ho*Wo
        diff = y - mean
        var = jnp.sum(diff * diff, axis=0, keepdims=True) * (1.0 / m)    # biased variance
        gamma = g_ref[pl.ds(layer, 1), :]
        beta = b_ref[pl.ds(layer, 1), :]
        scale = jax.lax.rsqrt(var + BN_EPS) * gamma                      # folded BN scale
        shift = beta - mean * scale                                      # folded BN shift
        return y * scale + shift

    # Layer 1: conv as (K-padded) im2col matmul on the MXU.
    a = relu_bn(jnp.dot(p1_ref[...], w1_ref[...],
                        preferred_element_type=jnp.float32), 0)

    # Layers 2-4: conv of the VMEM-resident activation via 9 per-tap matmuls.
    # G_tap rows are one-hot (or all-zero for padding), so G_tap @ a is an exact
    # strided-window gather; wt_ref[t] is the [Cin, Cout] weight slice for that tap.
    def conv_taps(act, gt_ref, wt_ref):
        y = None
        for t in range(9):
            p_t = jnp.dot(gt_ref[t], act, preferred_element_type=jnp.float32)
            c_t = jnp.dot(p_t, wt_ref[t], preferred_element_type=jnp.float32)
            y = c_t if y is None else y + c_t
        return y

    a = relu_bn(conv_taps(a, g2_ref, w2_ref), 1)
    a = relu_bn(conv_taps(a, g3_ref, w3_ref), 2)
    a = relu_bn(conv_taps(a, g4_ref, w4_ref), 3)
    o_ref[...] = a.astype(o_ref.dtype)


def _im2col_stride2_pad1(x_nhwc):
    # Glue only (runs once, on the kernel input): strided window extraction / concat.
    N, H, W, C = x_nhwc.shape
    Ho, Wo = _out_hw(H), _out_hw(W)
    xp = jnp.pad(x_nhwc, ((0, 0), (1, 1), (1, 1), (0, 0)))
    cols = [xp[:, kh:kh + 2 * Ho:2, kw:kw + 2 * Wo:2, :]
            for kh in range(3) for kw in range(3)]
    patches = jnp.concatenate(cols, axis=-1).reshape(N * Ho * Wo, 9 * C)
    return patches, (Ho, Wo)


def _make_tap_selectors(n, hin, win):
    # One-hot selection matrices [9, M_out, M_in] encoding stride-2 3x3 windows + zero pad.
    ho, wo = _out_hw(hin), _out_hw(win)
    g = np.zeros((9, n * ho * wo, n * hin * win), np.float32)
    for b in range(n):
        for i in range(ho):
            for j in range(wo):
                r = (b * ho + i) * wo + j
                for kh in range(3):
                    for kw in range(3):
                        hi, wi = 2 * i + kh - 1, 2 * j + kw - 1
                        if 0 <= hi < hin and 0 <= wi < win:
                            g[kh * 3 + kw, r, (b * hin + hi) * win + wi] = 1.0
    return jnp.asarray(g), (ho, wo)


def pack_params(params, n, h, w):
    # params: list of 4 tuples (conv weight [3,3,Cin,Cout], gamma [Cout], beta [Cout]).
    w1 = params[0][0]
    cin1, cout = w1.shape[2], w1.shape[3]
    w1_2d = jnp.pad(w1.reshape(9 * cin1, cout), ((0, K1_PAD - 9 * cin1), (0, 0)))
    w_taps = [params[l][0].reshape(9, params[l][0].shape[2], cout) for l in (1, 2, 3)]
    g = jnp.stack([p[1] for p in params])   # [4, Cout]
    b = jnp.stack([p[2] for p in params])   # [4, Cout]

    h1, w1s = _out_hw(h), _out_hw(w)
    g2, (h2, w2s) = _make_tap_selectors(n, h1, w1s)
    g3, (h3, w3s) = _make_tap_selectors(n, h2, w2s)
    g4, _ = _make_tap_selectors(n, h3, w3s)
    return (w1_2d, w_taps[0], w_taps[1], w_taps[2], g, b, g2, g3, g4)


def conv_input_model(img_nchw, packed):
    w1_2d, w2t, w3t, w4t, g, b, g2, g3, g4 = packed
    n = img_nchw.shape[0]
    cout = w1_2d.shape[1]

    x = jnp.transpose(img_nchw, (0, 2, 3, 1))                 # NCHW -> NHWC (glue)
    p1, _ = _im2col_stride2_pad1(x)
    p1 = jnp.pad(p1, ((0, 0), (0, K1_PAD - p1.shape[1])))     # K: 27 -> 32 (aligned)

    hf, wf = img_nchw.shape[2], img_nchw.shape[3]
    for _ in range(4):
        hf, wf = _out_hw(hf), _out_hw(wf)
    m_out = n * hf * wf

    args = (p1, w1_2d, w2t, w3t, w4t, g, b, g2, g3, g4)

    flops = 2 * p1.shape[0] * K1_PAD * cout
    for gl in (g2, g3, g4):
        mo, mi = gl.shape[1], gl.shape[2]
        flops += 9 * 2 * (mo * mi * cout + mo * cout * cout)
    bytes_accessed = sum(int(np.prod(a.shape)) * 4 for a in args) + m_out * cout * 4

    y = pl.pallas_call(
        fused_conv_model_kernel,
        out_shape=jax.ShapeDtypeStruct((m_out, cout), jnp.float32),
        in_specs=[pl.BlockSpec(memory_space=pltpu.MemorySpace.VMEM)] * len(args),
        out_specs=pl.BlockSpec(memory_space=pltpu.MemorySpace.VMEM),
        cost_estimate=pl.CostEstimate(flops=flops, transcendentals=4 * cout,
                                      bytes_accessed=bytes_accessed),
    )(*args)

    y = y.reshape(n, hf, wf, cout)
    return jnp.transpose(y, (0, 3, 1, 2))                     # NHWC -> NCHW


def reference(img_nchw, params):
    # Pure-JAX reference (train-mode BN) for correctness checking.
    x = img_nchw
    for (w, g, b) in params:
        w_oihw = jnp.transpose(w, (3, 2, 0, 1))               # [Cout, Cin, 3, 3]
        y = jax.lax.conv_general_dilated(
            x, w_oihw, window_strides=(2, 2), padding=((1, 1), (1, 1)),
            dimension_numbers=("NCHW", "OIHW", "NCHW"))
        y = jnp.maximum(y, 0.0)
        mean = jnp.mean(y, axis=(0, 2, 3), keepdims=True)
        var = jnp.mean((y - mean) ** 2, axis=(0, 2, 3), keepdims=True)
        x = (y - mean) / jnp.sqrt(var + BN_EPS) * g.reshape(1, -1, 1, 1) + b.reshape(1, -1, 1, 1)
    return x


def init_params(key):
    # Deterministic synthetic params. Conv weights stored as [kh, kw, Cin, Cout];
    # BN affine params at PyTorch defaults (gamma=1, beta=0).
    specs = [(3, 24), (24, 24), (24, 24), (24, 24)]
    params = []
    for cin, cout in specs:
        key, sub = jax.random.split(key)
        w = jax.random.normal(sub, (3, 3, cin, cout), jnp.float32) * (2.0 / (cin * 9)) ** 0.5
        params.append((w, jnp.ones((cout,), jnp.float32), jnp.zeros((cout,), jnp.float32)))
    return params


if __name__ == "__main__":
    key = jax.random.PRNGKey(0)
    kx, kp = jax.random.split(key)
    img = jax.random.normal(kx, (2, 3, 16, 16), jnp.float32)   # NCHW, 3 input channels
    params = init_params(kp)
    packed = pack_params(params, n=2, h=16, w=16)

    out = jax.jit(conv_input_model)(img, packed)
    out = jax.block_until_ready(out)
    assert out.shape == (2, 24, 1, 1), out.shape               # 16 -> 8 -> 4 -> 2 -> 1

    ref = reference(img, params)
    np.testing.assert_allclose(np.asarray(out), np.asarray(ref), atol=1e-3, rtol=1e-3)

    print("KERNEL_OK")
</pallas_src>

<mosaic_0001>
module attributes {stable_mosaic.version = 11 : i64} {
  func.func @fused_conv_model_kernel(%arg0: memref<128x32xf32, #tpu.memory_space<vmem>>, %arg1: memref<32x24xf32, #tpu.memory_space<vmem>>, %arg2: memref<9x24x24xf32, #tpu.memory_space<vmem>>, %arg3: memref<9x24x24xf32, #tpu.memory_space<vmem>>, %arg4: memref<9x24x24xf32, #tpu.memory_space<vmem>>, %arg5: memref<4x24xf32, #tpu.memory_space<vmem>>, %arg6: memref<4x24xf32, #tpu.memory_space<vmem>>, %arg7: memref<9x32x128xf32, #tpu.memory_space<vmem>>, %arg8: memref<9x8x32xf32, #tpu.memory_space<vmem>>, %arg9: memref<9x2x8xf32, #tpu.memory_space<vmem>>, %arg10: memref<2x24xf32, #tpu.memory_space<vmem>>) attributes {dimension_semantics = [], scalar_prefetch = 0 : i64, scratch_operands = 0 : i64, tpu.core_type = #tpu.core_type<tc>} {
    %c0 = arith.constant 0 : index
    %c0_0 = arith.constant 0 : index
    %0 = vector.load %arg0[%c0, %c0_0] : memref<128x32xf32, #tpu.memory_space<vmem>>, vector<128x32xf32>
    %c0_1 = arith.constant 0 : index
    %c0_2 = arith.constant 0 : index
    %1 = vector.load %arg1[%c0_1, %c0_2] : memref<32x24xf32, #tpu.memory_space<vmem>>, vector<32x24xf32>
    %cst = arith.constant dense<0.000000e+00> : vector<128x24xf32>
    %2 = tpu.matmul %0, %1, %cst {dimension_numbers = #tpu.dot_dimension_numbers<[1], [0], [0], [1], [0, 0, 1, 1], [], []>} : vector<128x32xf32>, vector<32x24xf32>, vector<128x24xf32> -> vector<128x24xf32>
    %cst_3 = arith.constant 0.000000e+00 : f32
    %3 = vector.broadcast %cst_3 : f32 to vector<128x24xf32>
    %4 = arith.maximumf %2, %3 : vector<128x24xf32>
    %cst_4 = arith.constant dense<0.000000e+00> : vector<24xf32>
    %5 = vector.multi_reduction <add>, %4, %cst_4 [0] : vector<128x24xf32> to vector<24xf32>
    %6 = vector.shape_cast %5 : vector<24xf32> to vector<1x24xf32>
    %cst_5 = arith.constant 7.812500e-03 : f32
    %7 = vector.broadcast %cst_5 : f32 to vector<1x24xf32>
    %8 = arith.mulf %6, %7 : vector<1x24xf32>
    %9 = vector.broadcast %8 : vector<1x24xf32> to vector<128x24xf32>
    %10 = arith.subf %4, %9 : vector<128x24xf32>
    %11 = arith.mulf %10, %10 : vector<128x24xf32>
    %cst_6 = arith.constant dense<0.000000e+00> : vector<24xf32>
    %12 = vector.multi_reduction <add>, %11, %cst_6 [0] : vector<128x24xf32> to vector<24xf32>
    %13 = vector.shape_cast %12 : vector<24xf32> to vector<1x24xf32>
    %cst_7 = arith.constant 7.812500e-03 : f32
    %14 = vector.broadcast %cst_7 : f32 to vector<1x24xf32>
    %15 = arith.mulf %13, %14 : vector<1x24xf32>
    %c0_8 = arith.constant 0 : index
    %c0_9 = arith.constant 0 : index
    %16 = vector.load %arg5[%c0_8, %c0_9] : memref<4x24xf32, #tpu.memory_space<vmem>>, vector<1x24xf32>
    %c0_10 = arith.constant 0 : index
    %c0_11 = arith.constant 0 : index
    %17 = vector.load %arg6[%c0_10, %c0_11] : memref<4x24xf32, #tpu.memory_space<vmem>>, vector<1x24xf32>
    %cst_12 = arith.constant 9.99999974E-6 : f32
    %18 = vector.broadcast %cst_12 : f32 to vector<1x24xf32>
    %19 = arith.addf %15, %18 : vector<1x24xf32>
    %20 = math.rsqrt %19 : vector<1x24xf32>
    %21 = arith.mulf %20, %16 : vector<1x24xf32>
    %22 = arith.mulf %8, %21 : vector<1x24xf32>
    %23 = arith.subf %17, %22 : vector<1x24xf32>
    %24 = vector.broadcast %21 : vector<1x24xf32> to vector<128x24xf32>
    %25 = arith.mulf %4, %24 : vector<128x24xf32>
    %26 = vector.broadcast %23 : vector<1x24xf32> to vector<128x24xf32>
    %27 = arith.addf %25, %26 : vector<128x24xf32>
    %c0_13 = arith.constant 0 : index
    %c0_14 = arith.constant 0 : index
    %c0_15 = arith.constant 0 : index
    %28 = vector.load %arg7[%c0_13, %c0_14, %c0_15] : memref<9x32x128xf32, #tpu.memory_space<vmem>>, vector<1x32x128xf32>
    %29 = vector.shape_cast %28 : vector<1x32x128xf32> to vector<32x128xf32>
    %cst_16 = arith.constant dense<0.000000e+00> : vector<32x24xf32>
    %30 = tpu.matmul %29, %27, %cst_16 {dimension_numbers = #tpu.dot_dimension_numbers<[1], [0], [0], [1], [0, 0, 1, 1], [], []>} : vector<32x128xf32>, vector<128x24xf32>, vector<32x24xf32> -> vector<32x24xf32>
    %c0_17 = arith.constant 0 : index
    %c0_18 = arith.constant 0 : index
    %c0_19 = arith.constant 0 : index
    %31 = vector.load %arg2[%c0_17, %c0_18, %c0_19] : memref<9x24x24xf32, #tpu.memory_space<vmem>>, vector<1x24x24xf32>
    %32 = vector.shape_cast %31 : vector<1x24x24xf32> to vector<24x24xf32>
    %cst_20 = arith.constant dense<0.000000e+00> : vector<32x24xf32>
    %33 = tpu.matmul %30, %32, %cst_20 {dimension_numbers = #tpu.dot_dimension_numbers<[1], [0], [0], [1], [0, 0, 1, 1], [], []>} : vector<32x24xf32>, vector<24x24xf32>, vector<32x24xf32> -> vector<32x24xf32>
    %c1 = arith.constant 1 : index
    %c0_21 = arith.constant 0 : index
    %c0_22 = arith.constant 0 : index
    %34 = vector.load %arg7[%c1, %c0_21, %c0_22] : memref<9x32x128xf32, #tpu.memory_space<vmem>>, vector<1x32x128xf32>
    %35 = vector.shape_cast %34 : vector<1x32x128xf32> to vector<32x128xf32>
    %cst_23 = arith.constant dense<0.000000e+00> : vector<32x24xf32>
    %36 = tpu.matmul %35, %27, %cst_23 {dimension_numbers = #tpu.dot_dimension_numbers<[1], [0], [0], [1], [0, 0, 1, 1], [], []>} : vector<32x128xf32>, vector<128x24xf32>, vector<32x24xf32> -> vector<32x24xf32>
    %c1_24 = arith.constant 1 : index
    %c0_25 = arith.constant 0 : index
    %c0_26 = arith.constant 0 : index
    %37 = vector.load %arg2[%c1_24, %c0_25, %c0_26] : memref<9x24x24xf32, #tpu.memory_space<vmem>>, vector<1x24x24xf32>
    %38 = vector.shape_cast %37 : vector<1x24x24xf32> to vector<24x24xf32>
    %cst_27 = arith.constant dense<0.000000e+00> : vector<32x24xf32>
    %39 = tpu.matmul %36, %38, %cst_27 {dimension_numbers = #tpu.dot_dimension_numbers<[1], [0], [0], [1], [0, 0, 1, 1], [], []>} : vector<32x24xf32>, vector<24x24xf32>, vector<32x24xf32> -> vector<32x24xf32>
    %40 = arith.addf %33, %39 : vector<32x24xf32>
    %c2 = arith.constant 2 : index
    %c0_28 = arith.constant 0 : index
    %c0_29 = arith.constant 0 : index
    %41 = vector.load %arg7[%c2, %c0_28, %c0_29] : memref<9x32x128xf32, #tpu.memory_space<vmem>>, vector<1x32x128xf32>
    %42 = vector.shape_cast %41 : vector<1x32x128xf32> to vector<32x128xf32>
    %cst_30 = arith.constant dense<0.000000e+00> : vector<32x24xf32>
    %43 = tpu.matmul %42, %27, %cst_30 {dimension_numbers = #tpu.dot_dimension_numbers<[1], [0], [0], [1], [0, 0, 1, 1], [], []>} : vector<32x128xf32>, vector<128x24xf32>, vector<32x24xf32> -> vector<32x24xf32>
    %c2_31 = arith.constant 2 : index
    %c0_32 = arith.constant 0 : index
    %c0_33 = arith.constant 0 : index
    %44 = vector.load %arg2[%c2_31, %c0_32, %c0_33] : memref<9x24x24xf32, #tpu.memory_space<vmem>>, vector<1x24x24xf32>
    %45 = vector.shape_cast %44 : vector<1x24x24xf32> to vector<24x24xf32>
    %cst_34 = arith.constant dense<0.000000e+00> : vector<32x24xf32>
    %46 = tpu.matmul %43, %45, %cst_34 {dimension_numbers = #tpu.dot_dimension_numbers<[1], [0], [0], [1], [0, 0, 1, 1], [], []>} : vector<32x24xf32>, vector<24x24xf32>, vector<32x24xf32> -> vector<32x24xf32>
    %47 = arith.addf %40, %46 : vector<32x24xf32>
    %c3 = arith.constant 3 : index
    %c0_35 = arith.constant 0 : index
    %c0_36 = arith.constant 0 : index
    %48 = vector.load %arg7[%c3, %c0_35, %c0_36] : memref<9x32x128xf32, #tpu.memory_space<vmem>>, vector<1x32x128xf32>
    %49 = vector.shape_cast %48 : vector<1x32x128xf32> to vector<32x128xf32>
    %cst_37 = arith.constant dense<0.000000e+00> : vector<32x24xf32>
    %50 = tpu.matmul %49, %27, %cst_37 {dimension_numbers = #tpu.dot_dimension_numbers<[1], [0], [0], [1], [0, 0, 1, 1], [], []>} : vector<32x128xf32>, vector<128x24xf32>, vector<32x24xf32> -> vector<32x24xf32>
    %c3_38 = arith.constant 3 : index
    %c0_39 = arith.constant 0 : index
    %c0_40 = arith.constant 0 : index
    %51 = vector.load %arg2[%c3_38, %c0_39, %c0_40] : memref<9x24x24xf32, #tpu.memory_space<vmem>>, vector<1x24x24xf32>
    %52 = vector.shape_cast %51 : vector<1x24x24xf32> to vector<24x24xf32>
    %cst_41 = arith.constant dense<0.000000e+00> : vector<32x24xf32>
    %53 = tpu.matmul %50, %52, %cst_41 {dimension_numbers = #tpu.dot_dimension_numbers<[1], [0], [0], [1], [0, 0, 1, 1], [], []>} : vector<32x24xf32>, vector<24x24xf32>, vector<32x24xf32> -> vector<32x24xf32>
    %54 = arith.addf %47, %53 : vector<32x24xf32>
    %c4 = arith.constant 4 : index
    %c0_42 = arith.constant 0 : index
    %c0_43 = arith.constant 0 : index
    %55 = vector.load %arg7[%c4, %c0_42, %c0_43] : memref<9x32x128xf32, #tpu.memory_space<vmem>>, vector<1x32x128xf32>
    %56 = vector.shape_cast %55 : vector<1x32x128xf32> to vector<32x128xf32>
    %cst_44 = arith.constant dense<0.000000e+00> : vector<32x24xf32>
    %57 = tpu.matmul %56, %27, %cst_44 {dimension_numbers = #tpu.dot_dimension_numbers<[1], [0], [0], [1], [0, 0, 1, 1], [], []>} : vector<32x128xf32>, vector<128x24xf32>, vector<32x24xf32> -> vector<32x24xf32>
    %c4_45 = arith.constant 4 : index
    %c0_46 = arith.constant 0 : index
    %c0_47 = arith.constant 0 : index
    %58 = vector.load %arg2[%c4_45, %c0_46, %c0_47] : memref<9x24x24xf32, #tpu.memory_space<vmem>>, vector<1x24x24xf32>
    %59 = vector.shape_cast %58 : vector<1x24x24xf32> to vector<24x24xf32>
    %cst_48 = arith.constant dense<0.000000e+00> : vector<32x24xf32>
    %60 = tpu.matmul %57, %59, %cst_48 {dimension_numbers = #tpu.dot_dimension_numbers<[1], [0], [0], [1], [0, 0, 1, 1], [], []>} : vector<32x24xf32>, vector<24x24xf32>, vector<32x24xf32> -> vector<32x24xf32>
    %61 = arith.addf %54, %60 : vector<32x24xf32>
    %c5 = arith.constant 5 : index
    %c0_49 = arith.constant 0 : index
    %c0_50 = arith.constant 0 : index
    %62 = vector.load %arg7[%c5, %c0_49, %c0_50] : memref<9x32x128xf32, #tpu.memory_space<vmem>>, vector<1x32x128xf32>
    %63 = vector.shape_cast %62 : vector<1x32x128xf32> to vector<32x128xf32>
    %cst_51 = arith.constant dense<0.000000e+00> : vector<32x24xf32>
    %64 = tpu.matmul %63, %27, %cst_51 {dimension_numbers = #tpu.dot_dimension_numbers<[1], [0], [0], [1], [0, 0, 1, 1], [], []>} : vector<32x128xf32>, vector<128x24xf32>, vector<32x24xf32> -> vector<32x24xf32>
    %c5_52 = arith.constant 5 : index
    %c0_53 = arith.constant 0 : index
    %c0_54 = arith.constant 0 : index
    %65 = vector.load %arg2[%c5_52, %c0_53, %c0_54] : memref<9x24x24xf32, #tpu.memory_space<vmem>>, vector<1x24x24xf32>
    %66 = vector.shape_cast %65 : vector<1x24x24xf32> to vector<24x24xf32>
    %cst_55 = arith.constant dense<0.000000e+00> : vector<32x24xf32>
    %67 = tpu.matmul %64, %66, %cst_55 {dimension_numbers = #tpu.dot_dimension_numbers<[1], [0], [0], [1], [0, 0, 1, 1], [], []>} : vector<32x24xf32>, vector<24x24xf32>, vector<32x24xf32> -> vector<32x24xf32>
    %68 = arith.addf %61, %67 : vector<32x24xf32>
    %c6 = arith.constant 6 : index
    %c0_56 = arith.constant 0 : index
    %c0_57 = arith.constant 0 : index
    %69 = vector.load %arg7[%c6, %c0_56, %c0_57] : memref<9x32x128xf32, #tpu.memory_space<vmem>>, vector<1x32x128xf32>
    %70 = vector.shape_cast %69 : vector<1x32x128xf32> to vector<32x128xf32>
    %cst_58 = arith.constant dense<0.000000e+00> : vector<32x24xf32>
    %71 = tpu.matmul %70, %27, %cst_58 {dimension_numbers = #tpu.dot_dimension_numbers<[1], [0], [0], [1], [0, 0, 1, 1], [], []>} : vector<32x128xf32>, vector<128x24xf32>, vector<32x24xf32> -> vector<32x24xf32>
    %c6_59 = arith.constant 6 : index
    %c0_60 = arith.constant 0 : index
    %c0_61 = arith.constant 0 : index
    %72 = vector.load %arg2[%c6_59, %c0_60, %c0_61] : memref<9x24x24xf32, #tpu.memory_space<vmem>>, vector<1x24x24xf32>
    %73 = vector.shape_cast %72 : vector<1x24x24xf32> to vector<24x24xf32>
    %cst_62 = arith.constant dense<0.000000e+00> : vector<32x24xf32>
    %74 = tpu.matmul %71, %73, %cst_62 {dimension_numbers = #tpu.dot_dimension_numbers<[1], [0], [0], [1], [0, 0, 1, 1], [], []>} : vector<32x24xf32>, vector<24x24xf32>, vector<32x24xf32> -> vector<32x24xf32>
    %75 = arith.addf %68, %74 : vector<32x24xf32>
    %c7 = arith.constant 7 : index
    %c0_63 = arith.constant 0 : index
    %c0_64 = arith.constant 0 : index
    %76 = vector.load %arg7[%c7, %c0_63, %c0_64] : memref<9x32x128xf32, #tpu.memory_space<vmem>>, vector<1x32x128xf32>
    %77 = vector.shape_cast %76 : vector<1x32x128xf32> to vector<32x128xf32>
    %cst_65 = arith.constant dense<0.000000e+00> : vector<32x24xf32>
    %78 = tpu.matmul %77, %27, %cst_65 {dimension_numbers = #tpu.dot_dimension_numbers<[1], [0], [0], [1], [0, 0, 1, 1], [], []>} : vector<32x128xf32>, vector<128x24xf32>, vector<32x24xf32> -> vector<32x24xf32>
    %c7_66 = arith.constant 7 : index
    %c0_67 = arith.constant 0 : index
    %c0_68 = arith.constant 0 : index
    %79 = vector.load %arg2[%c7_66, %c0_67, %c0_68] : memref<9x24x24xf32, #tpu.memory_space<vmem>>, vector<1x24x24xf32>
    %80 = vector.shape_cast %79 : vector<1x24x24xf32> to vector<24x24xf32>
    %cst_69 = arith.constant dense<0.000000e+00> : vector<32x24xf32>
    %81 = tpu.matmul %78, %80, %cst_69 {dimension_numbers = #tpu.dot_dimension_numbers<[1], [0], [0], [1], [0, 0, 1, 1], [], []>} : vector<32x24xf32>, vector<24x24xf32>, vector<32x24xf32> -> vector<32x24xf32>
    %82 = arith.addf %75, %81 : vector<32x24xf32>
    %c8 = arith.constant 8 : index
    %c0_70 = arith.constant 0 : index
    %c0_71 = arith.constant 0 : index
    %83 = vector.load %arg7[%c8, %c0_70, %c0_71] : memref<9x32x128xf32, #tpu.memory_space<vmem>>, vector<1x32x128xf32>
    %84 = vector.shape_cast %83 : vector<1x32x128xf32> to vector<32x128xf32>
    %cst_72 = arith.constant dense<0.000000e+00> : vector<32x24xf32>
    %85 = tpu.matmul %84, %27, %cst_72 {dimension_numbers = #tpu.dot_dimension_numbers<[1], [0], [0], [1], [0, 0, 1, 1], [], []>} : vector<32x128xf32>, vector<128x24xf32>, vector<32x24xf32> -> vector<32x24xf32>
    %c8_73 = arith.constant 8 : index
    %c0_74 = arith.constant 0 : index
    %c0_75 = arith.constant 0 : index
    %86 = vector.load %arg2[%c8_73, %c0_74, %c0_75] : memref<9x24x24xf32, #tpu.memory_space<vmem>>, vector<1x24x24xf32>
    %87 = vector.shape_cast %86 : vector<1x24x24xf32> to vector<24x24xf32>
    %cst_76 = arith.constant dense<0.000000e+00> : vector<32x24xf32>
    %88 = tpu.matmul %85, %87, %cst_76 {dimension_numbers = #tpu.dot_dimension_numbers<[1], [0], [0], [1], [0, 0, 1, 1], [], []>} : vector<32x24xf32>, vector<24x24xf32>, vector<32x24xf32> -> vector<32x24xf32>
    %89 = arith.addf %82, %88 : vector<32x24xf32>
    %cst_77 = arith.constant 0.000000e+00 : f32
    %90 = vector.broadcast %cst_77 : f32 to vector<32x24xf32>
    %91 = arith.maximumf %89, %90 : vector<32x24xf32>
    %cst_78 = arith.constant dense<0.000000e+00> : vector<24xf32>
    %92 = vector.multi_reduction <add>, %91, %cst_78 [0] : vector<32x24xf32> to vector<24xf32>
    %93 = vector.shape_cast %92 : vector<24xf32> to vector<1x24xf32>
    %cst_79 = arith.constant 3.125000e-02 : f32
    %94 = vector.broadcast %cst_79 : f32 to vector<1x24xf32>
    %95 = arith.mulf %93, %94 : vector<1x24xf32>
    %96 = vector.broadcast %95 : vector<1x24xf32> to vector<32x24xf32>
    %97 = arith.subf %91, %96 : vector<32x24xf32>
    %98 = arith.mulf %97, %97 : vector<32x24xf32>
    %cst_80 = arith.constant dense<0.000000e+00> : vector<24xf32>
    %99 = vector.multi_reduction <add>, %98, %cst_80 [0] : vector<32x24xf32> to vector<24xf32>
    %100 = vector.shape_cast %99 : vector<24xf32> to vector<1x24xf32>
    %cst_81 = arith.constant 3.125000e-02 : f32
    %101 = vector.broadcast %cst_81 : f32 to vector<1x24xf32>
    %102 = arith.mulf %100, %101 : vector<1x24xf32>
    %c1_82 = arith.constant 1 : index
    %c0_83 = arith.constant 0 : index
    %103 = vector.load %arg5[%c1_82, %c0_83] : memref<4x24xf32, #tpu.memory_space<vmem>>, vector<1x24xf32>
    %c1_84 = arith.constant 1 : index
    %c0_85 = arith.constant 0 : index
    %104 = vector.load %arg6[%c1_84, %c0_85] : memref<4x24xf32, #tpu.memory_space<vmem>>, vector<1x24xf32>
    %cst_86 = arith.constant 9.99999974E-6 : f32
    %105 = vector.broadcast %cst_86 : f32 to vector<1x24xf32>
    %106 = arith.addf %102, %105 : vector<1x24xf32>
    %107 = math.rsqrt %106 : vector<1x24xf32>
    %108 = arith.mulf %107, %103 : vector<1x24xf32>
    %109 = arith.mulf %95, %108 : vector<1x24xf32>
    %110 = arith.subf %104, %109 : vector<1x24xf32>
    %111 = vector.broadcast %108 : vector<1x24xf32> to vector<32x24xf32>
    %112 = arith.mulf %91, %111 : vector<32x24xf32>
    %113 = vector.broadcast %110 : vector<1x24xf32> to vector<32x24xf32>
    %114 = arith.addf %112, %113 : vector<32x24xf32>
    %c0_87 = arith.constant 0 : index
    %c0_88 = arith.constant 0 : index
    %c0_89 = arith.constant 0 : index
    %115 = vector.load %arg8[%c0_87, %c0_88, %c0_89] : memref<9x8x32xf32, #tpu.memory_space<vmem>>, vector<1x8x32xf32>
    %116 = vector.shape_cast %115 : vector<1x8x32xf32> to vector<8x32xf32>
    %cst_90 = arith.constant dense<0.000000e+00> : vector<8x24xf32>
    %117 = tpu.matmul %116, %114, %cst_90 {dimension_numbers = #tpu.dot_dimension_numbers<[1], [0], [0], [1], [0, 0, 1, 1], [], []>} : vector<8x32xf32>, vector<32x24xf32>, vector<8x24xf32> -> vector<8x24xf32>
    %c0_91 = arith.constant 0 : index
    %c0_92 = arith.constant 0 : index
    %c0_93 = arith.constant 0 : index
    %118 = vector.load %arg3[%c0_91, %c0_92, %c0_93] : memref<9x24x24xf32, #tpu.memory_space<vmem>>, vector<1x24x24xf32>
    %119 = vector.shape_cast %118 : vector<1x24x24xf32> to vector<24x24xf32>
    %cst_94 = arith.constant dense<0.000000e+00> : vector<8x24xf32>
    %120 = tpu.matmul %117, %119, %cst_94 {dimension_numbers = #tpu.dot_dimension_numbers<[1], [0], [0], [1], [0, 0, 1, 1], [], []>} : vector<8x24xf32>, vector<24x24xf32>, vector<8x24xf32> -> vector<8x24xf32>
    %c1_95 = arith.constant 1 : index
    %c0_96 = arith.constant 0 : index
    %c0_97 = arith.constant 0 : index
    %121 = vector.load %arg8[%c1_95, %c0_96, %c0_97] : memref<9x8x32xf32, #tpu.memory_space<vmem>>, vector<1x8x32xf32>
    %122 = vector.shape_cast %121 : vector<1x8x32xf32> to vector<8x32xf32>
    %cst_98 = arith.constant dense<0.000000e+00> : vector<8x24xf32>
    %123 = tpu.matmul %122, %114, %cst_98 {dimension_numbers = #tpu.dot_dimension_numbers<[1], [0], [0], [1], [0, 0, 1, 1], [], []>} : vector<8x32xf32>, vector<32x24xf32>, vector<8x24xf32> -> vector<8x24xf32>
    %c1_99 = arith.constant 1 : index
    %c0_100 = arith.constant 0 : index
    %c0_101 = arith.constant 0 : index
    %124 = vector.load %arg3[%c1_99, %c0_100, %c0_101] : memref<9x24x24xf32, #tpu.memory_space<vmem>>, vector<1x24x24xf32>
    %125 = vector.shape_cast %124 : vector<1x24x24xf32> to vector<24x24xf32>
    %cst_102 = arith.constant dense<0.000000e+00> : vector<8x24xf32>
    %126 = tpu.matmul %123, %125, %cst_102 {dimension_numbers = #tpu.dot_dimension_numbers<[1], [0], [0], [1], [0, 0, 1, 1], [], []>} : vector<8x24xf32>, vector<24x24xf32>, vector<8x24xf32> -> vector<8x24xf32>
    %127 = arith.addf %120, %126 : vector<8x24xf32>
    %c2_103 = arith.constant 2 : index
    %c0_104 = arith.constant 0 : index
    %c0_105 = arith.constant 0 : index
    %128 = vector.load %arg8[%c2_103, %c0_104, %c0_105] : memref<9x8x32xf32, #tpu.memory_space<vmem>>, vector<1x8x32xf32>
    %129 = vector.shape_cast %128 : vector<1x8x32xf32> to vector<8x32xf32>
    %cst_106 = arith.constant dense<0.000000e+00> : vector<8x24xf32>
    %130 = tpu.matmul %129, %114, %cst_106 {dimension_numbers = #tpu.dot_dimension_numbers<[1], [0], [0], [1], [0, 0, 1, 1], [], []>} : vector<8x32xf32>, vector<32x24xf32>, vector<8x24xf32> -> vector<8x24xf32>
    %c2_107 = arith.constant 2 : index
    %c0_108 = arith.constant 0 : index
    %c0_109 = arith.constant 0 : index
    %131 = vector.load %arg3[%c2_107, %c0_108, %c0_109] : memref<9x24x24xf32, #tpu.memory_space<vmem>>, vector<1x24x24xf32>
    %132 = vector.shape_cast %131 : vector<1x24x24xf32> to vector<24x24xf32>
    %cst_110 = arith.constant dense<0.000000e+00> : vector<8x24xf32>
    %133 = tpu.matmul %130, %132, %cst_110 {dimension_numbers = #tpu.dot_dimension_numbers<[1], [0], [0], [1], [0, 0, 1, 1], [], []>} : vector<8x24xf32>, vector<24x24xf32>, vector<8x24xf32> -> vector<8x24xf32>
    %134 = arith.addf %127, %133 : vector<8x24xf32>
    %c3_111 = arith.constant 3 : index
    %c0_112 = arith.constant 0 : index
    %c0_113 = arith.constant 0 : index
    %135 = vector.load %arg8[%c3_111, %c0_112, %c0_113] : memref<9x8x32xf32, #tpu.memory_space<vmem>>, vector<1x8x32xf32>
    %136 = vector.shape_cast %135 : vector<1x8x32xf32> to vector<8x32xf32>
    %cst_114 = arith.constant dense<0.000000e+00> : vector<8x24xf32>
    %137 = tpu.matmul %136, %114, %cst_114 {dimension_numbers = #tpu.dot_dimension_numbers<[1], [0], [0], [1], [0, 0, 1, 1], [], []>} : vector<8x32xf32>, vector<32x24xf32>, vector<8x24xf32> -> vector<8x24xf32>
    %c3_115 = arith.constant 3 : index
    %c0_116 = arith.constant 0 : index
    %c0_117 = arith.constant 0 : index
    %138 = vector.load %arg3[%c3_115, %c0_116, %c0_117] : memref<9x24x24xf32, #tpu.memory_space<vmem>>, vector<1x24x24xf32>
    %139 = vector.shape_cast %138 : vector<1x24x24xf32> to vector<24x24xf32>
    %cst_118 = arith.constant dense<0.000000e+00> : vector<8x24xf32>
    %140 = tpu.matmul %137, %139, %cst_118 {dimension_numbers = #tpu.dot_dimension_numbers<[1], [0], [0], [1], [0, 0, 1, 1], [], []>} : vector<8x24xf32>, vector<24x24xf32>, vector<8x24xf32> -> vector<8x24xf32>
    %141 = arith.addf %134, %140 : vector<8x24xf32>
    %c4_119 = arith.constant 4 : index
    %c0_120 = arith.constant 0 : index
    %c0_121 = arith.constant 0 : index
    %142 = vector.load %arg8[%c4_119, %c0_120, %c0_121] : memref<9x8x32xf32, #tpu.memory_space<vmem>>, vector<1x8x32xf32>
    %143 = vector.shape_cast %142 : vector<1x8x32xf32> to vector<8x32xf32>
    %cst_122 = arith.constant dense<0.000000e+00> : vector<8x24xf32>
    %144 = tpu.matmul %143, %114, %cst_122 {dimension_numbers = #tpu.dot_dimension_numbers<[1], [0], [0], [1], [0, 0, 1, 1], [], []>} : vector<8x32xf32>, vector<32x24xf32>, vector<8x24xf32> -> vector<8x24xf32>
    %c4_123 = arith.constant 4 : index
    %c0_124 = arith.constant 0 : index
    %c0_125 = arith.constant 0 : index
    %145 = vector.load %arg3[%c4_123, %c0_124, %c0_125] : memref<9x24x24xf32, #tpu.memory_space<vmem>>, vector<1x24x24xf32>
    %146 = vector.shape_cast %145 : vector<1x24x24xf32> to vector<24x24xf32>
    %cst_126 = arith.constant dense<0.000000e+00> : vector<8x24xf32>
    %147 = tpu.matmul %144, %146, %cst_126 {dimension_numbers = #tpu.dot_dimension_numbers<[1], [0], [0], [1], [0, 0, 1, 1], [], []>} : vector<8x24xf32>, vector<24x24xf32>, vector<8x24xf32> -> vector<8x24xf32>
    %148 = arith.addf %141, %147 : vector<8x24xf32>
    %c5_127 = arith.constant 5 : index
    %c0_128 = arith.constant 0 : index
    %c0_129 = arith.constant 0 : index
    %149 = vector.load %arg8[%c5_127, %c0_128, %c0_129] : memref<9x8x32xf32, #tpu.memory_space<vmem>>, vector<1x8x32xf32>
    %150 = vector.shape_cast %149 : vector<1x8x32xf32> to vector<8x32xf32>
    %cst_130 = arith.constant dense<0.000000e+00> : vector<8x24xf32>
    %151 = tpu.matmul %150, %114, %cst_130 {dimension_numbers = #tpu.dot_dimension_numbers<[1], [0], [0], [1], [0, 0, 1, 1], [], []>} : vector<8x32xf32>, vector<32x24xf32>, vector<8x24xf32> -> vector<8x24xf32>
    %c5_131 = arith.constant 5 : index
    %c0_132 = arith.constant 0 : index
    %c0_133 = arith.constant 0 : index
    %152 = vector.load %arg3[%c5_131, %c0_132, %c0_133] : memref<9x24x24xf32, #tpu.memory_space<vmem>>, vector<1x24x24xf32>
    %153 = vector.shape_cast %152 : vector<1x24x24xf32> to vector<24x24xf32>
    %cst_134 = arith.constant dense<0.000000e+00> : vector<8x24xf32>
    %154 = tpu.matmul %151, %153, %cst_134 {dimension_numbers = #tpu.dot_dimension_numbers<[1], [0], [0], [1], [0, 0, 1, 1], [], []>} : vector<8x24xf32>, vector<24x24xf32>, vector<8x24xf32> -> vector<8x24xf32>
    %155 = arith.addf %148, %154 : vector<8x24xf32>
    %c6_135 = arith.constant 6 : index
    %c0_136 = arith.constant 0 : index
    %c0_137 = arith.constant 0 : index
    %156 = vector.load %arg8[%c6_135, %c0_136, %c0_137] : memref<9x8x32xf32, #tpu.memory_space<vmem>>, vector<1x8x32xf32>
    %157 = vector.shape_cast %156 : vector<1x8x32xf32> to vector<8x32xf32>
    %cst_138 = arith.constant dense<0.000000e+00> : vector<8x24xf32>
    %158 = tpu.matmul %157, %114, %cst_138 {dimension_numbers = #tpu.dot_dimension_numbers<[1], [0], [0], [1], [0, 0, 1, 1], [], []>} : vector<8x32xf32>, vector<32x24xf32>, vector<8x24xf32> -> vector<8x24xf32>
    %c6_139 = arith.constant 6 : index
    %c0_140 = arith.constant 0 : index
    %c0_141 = arith.constant 0 : index
    %159 = vector.load %arg3[%c6_139, %c0_140, %c0_141] : memref<9x24x24xf32, #tpu.memory_space<vmem>>, vector<1x24x24xf32>
    %160 = vector.shape_cast %159 : vector<1x24x24xf32> to vector<24x24xf32>
    %cst_142 = arith.constant dense<0.000000e+00> : vector<8x24xf32>
    %161 = tpu.matmul %158, %160, %cst_142 {dimension_numbers = #tpu.dot_dimension_numbers<[1], [0], [0], [1], [0, 0, 1, 1], [], []>} : vector<8x24xf32>, vector<24x24xf32>, vector<8x24xf32> -> vector<8x24xf32>
    %162 = arith.addf %155, %161 : vector<8x24xf32>
    %c7_143 = arith.constant 7 : index
    %c0_144 = arith.constant 0 : index
    %c0_145 = arith.constant 0 : index
    %163 = vector.load %arg8[%c7_143, %c0_144, %c0_145] : memref<9x8x32xf32, #tpu.memory_space<vmem>>, vector<1x8x32xf32>
    %164 = vector.shape_cast %163 : vector<1x8x32xf32> to vector<8x32xf32>
    %cst_146 = arith.constant dense<0.000000e+00> : vector<8x24xf32>
    %165 = tpu.matmul %164, %114, %cst_146 {dimension_numbers = #tpu.dot_dimension_numbers<[1], [0], [0], [1], [0, 0, 1, 1], [], []>} : vector<8x32xf32>, vector<32x24xf32>, vector<8x24xf32> -> vector<8x24xf32>
    %c7_147 = arith.constant 7 : index
    %c0_148 = arith.constant 0 : index
    %c0_149 = arith.constant 0 : index
    %166 = vector.load %arg3[%c7_147, %c0_148, %c0_149] : memref<9x24x24xf32, #tpu.memory_space<vmem>>, vector<1x24x24xf32>
    %167 = vector.shape_cast %166 : vector<1x24x24xf32> to vector<24x24xf32>
    %cst_150 = arith.constant dense<0.000000e+00> : vector<8x24xf32>
    %168 = tpu.matmul %165, %167, %cst_150 {dimension_numbers = #tpu.dot_dimension_numbers<[1], [0], [0], [1], [0, 0, 1, 1], [], []>} : vector<8x24xf32>, vector<24x24xf32>, vector<8x24xf32> -> vector<8x24xf32>
    %169 = arith.addf %162, %168 : vector<8x24xf32>
    %c8_151 = arith.constant 8 : index
    %c0_152 = arith.constant 0 : index
    %c0_153 = arith.constant 0 : index
    %170 = vector.load %arg8[%c8_151, %c0_152, %c0_153] : memref<9x8x32xf32, #tpu.memory_space<vmem>>, vector<1x8x32xf32>
    %171 = vector.shape_cast %170 : vector<1x8x32xf32> to vector<8x32xf32>
    %cst_154 = arith.constant dense<0.000000e+00> : vector<8x24xf32>
    %172 = tpu.matmul %171, %114, %cst_154 {dimension_numbers = #tpu.dot_dimension_numbers<[1], [0], [0], [1], [0, 0, 1, 1], [], []>} : vector<8x32xf32>, vector<32x24xf32>, vector<8x24xf32> -> vector<8x24xf32>
    %c8_155 = arith.constant 8 : index
    %c0_156 = arith.constant 0 : index
    %c0_157 = arith.constant 0 : index
    %173 = vector.load %arg3[%c8_155, %c0_156, %c0_157] : memref<9x24x24xf32, #tpu.memory_space<vmem>>, vector<1x24x24xf32>
    %174 = vector.shape_cast %173 : vector<1x24x24xf32> to vector<24x24xf32>
    %cst_158 = arith.constant dense<0.000000e+00> : vector<8x24xf32>
    %175 = tpu.matmul %172, %174, %cst_158 {dimension_numbers = #tpu.dot_dimension_numbers<[1], [0], [0], [1], [0, 0, 1, 1], [], []>} : vector<8x24xf32>, vector<24x24xf32>, vector<8x24xf32> -> vector<8x24xf32>
    %176 = arith.addf %169, %175 : vector<8x24xf32>
    %cst_159 = arith.constant 0.000000e+00 : f32
    %177 = vector.broadcast %cst_159 : f32 to vector<8x24xf32>
    %178 = arith.maximumf %176, %177 : vector<8x24xf32>
    %cst_160 = arith.constant dense<0.000000e+00> : vector<24xf32>
    %179 = vector.multi_reduction <add>, %178, %cst_160 [0] : vector<8x24xf32> to vector<24xf32>
    %180 = vector.shape_cast %179 : vector<24xf32> to vector<1x24xf32>
    %cst_161 = arith.constant 1.250000e-01 : f32
    %181 = vector.broadcast %cst_161 : f32 to vector<1x24xf32>
    %182 = arith.mulf %180, %181 : vector<1x24xf32>
    %183 = vector.broadcast %182 : vector<1x24xf32> to vector<8x24xf32>
    %184 = arith.subf %178, %183 : vector<8x24xf32>
    %185 = arith.mulf %184, %184 : vector<8x24xf32>
    %cst_162 = arith.constant dense<0.000000e+00> : vector<24xf32>
    %186 = vector.multi_reduction <add>, %185, %cst_162 [0] : vector<8x24xf32> to vector<24xf32>
    %187 = vector.shape_cast %186 : vector<24xf32> to vector<1x24xf32>
    %cst_163 = arith.constant 1.250000e-01 : f32
    %188 = vector.broadcast %cst_163 : f32 to vector<1x24xf32>
    %189 = arith.mulf %187, %188 : vector<1x24xf32>
    %c2_164 = arith.constant 2 : index
    %c0_165 = arith.constant 0 : index
    %190 = vector.load %arg5[%c2_164, %c0_165] : memref<4x24xf32, #tpu.memory_space<vmem>>, vector<1x24xf32>
    %c2_166 = arith.constant 2 : index
    %c0_167 = arith.constant 0 : index
    %191 = vector.load %arg6[%c2_166, %c0_167] : memref<4x24xf32, #tpu.memory_space<vmem>>, vector<1x24xf32>
    %cst_168 = arith.constant 9.99999974E-6 : f32
    %192 = vector.broadcast %cst_168 : f32 to vector<1x24xf32>
    %193 = arith.addf %189, %192 : vector<1x24xf32>
    %194 = math.rsqrt %193 : vector<1x24xf32>
    %195 = arith.mulf %194, %190 : vector<1x24xf32>
    %196 = arith.mulf %182, %195 : vector<1x24xf32>
    %197 = arith.subf %191, %196 : vector<1x24xf32>
    %198 = vector.broadcast %195 : vector<1x24xf32> to vector<8x24xf32>
    %199 = arith.mulf %178, %198 : vector<8x24xf32>
    %200 = vector.broadcast %197 : vector<1x24xf32> to vector<8x24xf32>
    %201 = arith.addf %199, %200 : vector<8x24xf32>
    %c0_169 = arith.constant 0 : index
    %c0_170 = arith.constant 0 : index
    %c0_171 = arith.constant 0 : index
    %202 = vector.load %arg9[%c0_169, %c0_170, %c0_171] : memref<9x2x8xf32, #tpu.memory_space<vmem>>, vector<1x2x8xf32>
    %203 = vector.shape_cast %202 : vector<1x2x8xf32> to vector<2x8xf32>
    %cst_172 = arith.constant dense<0.000000e+00> : vector<2x24xf32>
    %204 = tpu.matmul %203, %201, %cst_172 {dimension_numbers = #tpu.dot_dimension_numbers<[1], [0], [0], [1], [0, 0, 1, 1], [], []>} : vector<2x8xf32>, vector<8x24xf32>, vector<2x24xf32> -> vector<2x24xf32>
    %c0_173 = arith.constant 0 : index
    %c0_174 = arith.constant 0 : index
    %c0_175 = arith.constant 0 : index
    %205 = vector.load %arg4[%c0_173, %c0_174, %c0_175] : memref<9x24x24xf32, #tpu.memory_space<vmem>>, vector<1x24x24xf32>
    %206 = vector.shape_cast %205 : vector<1x24x24xf32> to vector<24x24xf32>
    %cst_176 = arith.constant dense<0.000000e+00> : vector<2x24xf32>
    %207 = tpu.matmul %204, %206, %cst_176 {dimension_numbers = #tpu.dot_dimension_numbers<[1], [0], [0], [1], [0, 0, 1, 1], [], []>} : vector<2x24xf32>, vector<24x24xf32>, vector<2x24xf32> -> vector<2x24xf32>
    %c1_177 = arith.constant 1 : index
    %c0_178 = arith.constant 0 : index
    %c0_179 = arith.constant 0 : index
    %208 = vector.load %arg9[%c1_177, %c0_178, %c0_179] : memref<9x2x8xf32, #tpu.memory_space<vmem>>, vector<1x2x8xf32>
    %209 = vector.shape_cast %208 : vector<1x2x8xf32> to vector<2x8xf32>
    %cst_180 = arith.constant dense<0.000000e+00> : vector<2x24xf32>
    %210 = tpu.matmul %209, %201, %cst_180 {dimension_numbers = #tpu.dot_dimension_numbers<[1], [0], [0], [1], [0, 0, 1, 1], [], []>} : vector<2x8xf32>, vector<8x24xf32>, vector<2x24xf32> -> vector<2x24xf32>
    %c1_181 = arith.constant 1 : index
    %c0_182 = arith.constant 0 : index
    %c0_183 = arith.constant 0 : index
    %211 = vector.load %arg4[%c1_181, %c0_182, %c0_183] : memref<9x24x24xf32, #tpu.memory_space<vmem>>, vector<1x24x24xf32>
    %212 = vector.shape_cast %211 : vector<1x24x24xf32> to vector<24x24xf32>
    %cst_184 = arith.constant dense<0.000000e+00> : vector<2x24xf32>
    %213 = tpu.matmul %210, %212, %cst_184 {dimension_numbers = #tpu.dot_dimension_numbers<[1], [0], [0], [1], [0, 0, 1, 1], [], []>} : vector<2x24xf32>, vector<24x24xf32>, vector<2x24xf32> -> vector<2x24xf32>
    %214 = arith.addf %207, %213 : vector<2x24xf32>
    %c2_185 = arith.constant 2 : index
    %c0_186 = arith.constant 0 : index
    %c0_187 = arith.constant 0 : index
    %215 = vector.load %arg9[%c2_185, %c0_186, %c0_187] : memref<9x2x8xf32, #tpu.memory_space<vmem>>, vector<1x2x8xf32>
    %216 = vector.shape_cast %215 : vector<1x2x8xf32> to vector<2x8xf32>
    %cst_188 = arith.constant dense<0.000000e+00> : vector<2x24xf32>
    %217 = tpu.matmul %216, %201, %cst_188 {dimension_numbers = #tpu.dot_dimension_numbers<[1], [0], [0], [1], [0, 0, 1, 1], [], []>} : vector<2x8xf32>, vector<8x24xf32>, vector<2x24xf32> -> vector<2x24xf32>
    %c2_189 = arith.constant 2 : index
    %c0_190 = arith.constant 0 : index
    %c0_191 = arith.constant 0 : index
    %218 = vector.load %arg4[%c2_189, %c0_190, %c0_191] : memref<9x24x24xf32, #tpu.memory_space<vmem>>, vector<1x24x24xf32>
    %219 = vector.shape_cast %218 : vector<1x24x24xf32> to vector<24x24xf32>
    %cst_192 = arith.constant dense<0.000000e+00> : vector<2x24xf32>
    %220 = tpu.matmul %217, %219, %cst_192 {dimension_numbers = #tpu.dot_dimension_numbers<[1], [0], [0], [1], [0, 0, 1, 1], [], []>} : vector<2x24xf32>, vector<24x24xf32>, vector<2x24xf32> -> vector<2x24xf32>
    %221 = arith.addf %214, %220 : vector<2x24xf32>
    %c3_193 = arith.constant 3 : index
    %c0_194 = arith.constant 0 : index
    %c0_195 = arith.constant 0 : index
    %222 = vector.load %arg9[%c3_193, %c0_194, %c0_195] : memref<9x2x8xf32, #tpu.memory_space<vmem>>, vector<1x2x8xf32>
    %223 = vector.shape_cast %222 : vector<1x2x8xf32> to vector<2x8xf32>
    %cst_196 = arith.constant dense<0.000000e+00> : vector<2x24xf32>
    %224 = tpu.matmul %223, %201, %cst_196 {dimension_numbers = #tpu.dot_dimension_numbers<[1], [0], [0], [1], [0, 0, 1, 1], [], []>} : vector<2x8xf32>, vector<8x24xf32>, vector<2x24xf32> -> vector<2x24xf32>
    %c3_197 = arith.constant 3 : index
    %c0_198 = arith.constant 0 : index
    %c0_199 = arith.constant 0 : index
    %225 = vector.load %arg4[%c3_197, %c0_198, %c0_199] : memref<9x24x24xf32, #tpu.memory_space<vmem>>, vector<1x24x24xf32>
    %226 = vector.shape_cast %225 : vector<1x24x24xf32> to vector<24x24xf32>
    %cst_200 = arith.constant dense<0.000000e+00> : vector<2x24xf32>
    %227 = tpu.matmul %224, %226, %cst_200 {dimension_numbers = #tpu.dot_dimension_numbers<[1], [0], [0], [1], [0, 0, 1, 1], [], []>} : vector<2x24xf32>, vector<24x24xf32>, vector<2x24xf32> -> vector<2x24xf32>
    %228 = arith.addf %221, %227 : vector<2x24xf32>
    %c4_201 = arith.constant 4 : index
    %c0_202 = arith.constant 0 : index
    %c0_203 = arith.constant 0 : index
    %229 = vector.load %arg9[%c4_201, %c0_202, %c0_203] : memref<9x2x8xf32, #tpu.memory_space<vmem>>, vector<1x2x8xf32>
    %230 = vector.shape_cast %229 : vector<1x2x8xf32> to vector<2x8xf32>
    %cst_204 = arith.constant dense<0.000000e+00> : vector<2x24xf32>
    %231 = tpu.matmul %230, %201, %cst_204 {dimension_numbers = #tpu.dot_dimension_numbers<[1], [0], [0], [1], [0, 0, 1, 1], [], []>} : vector<2x8xf32>, vector<8x24xf32>, vector<2x24xf32> -> vector<2x24xf32>
    %c4_205 = arith.constant 4 : index
    %c0_206 = arith.constant 0 : index
    %c0_207 = arith.constant 0 : index
    %232 = vector.load %arg4[%c4_205, %c0_206, %c0_207] : memref<9x24x24xf32, #tpu.memory_space<vmem>>, vector<1x24x24xf32>
    %233 = vector.shape_cast %232 : vector<1x24x24xf32> to vector<24x24xf32>
    %cst_208 = arith.constant dense<0.000000e+00> : vector<2x24xf32>
    %234 = tpu.matmul %231, %233, %cst_208 {dimension_numbers = #tpu.dot_dimension_numbers<[1], [0], [0], [1], [0, 0, 1, 1], [], []>} : vector<2x24xf32>, vector<24x24xf32>, vector<2x24xf32> -> vector<2x24xf32>
    %235 = arith.addf %228, %234 : vector<2x24xf32>
    %c5_209 = arith.constant 5 : index
    %c0_210 = arith.constant 0 : index
    %c0_211 = arith.constant 0 : index
    %236 = vector.load %arg9[%c5_209, %c0_210, %c0_211] : memref<9x2x8xf32, #tpu.memory_space<vmem>>, vector<1x2x8xf32>
    %237 = vector.shape_cast %236 : vector<1x2x8xf32> to vector<2x8xf32>
    %cst_212 = arith.constant dense<0.000000e+00> : vector<2x24xf32>
    %238 = tpu.matmul %237, %201, %cst_212 {dimension_numbers = #tpu.dot_dimension_numbers<[1], [0], [0], [1], [0, 0, 1, 1], [], []>} : vector<2x8xf32>, vector<8x24xf32>, vector<2x24xf32> -> vector<2x24xf32>
    %c5_213 = arith.constant 5 : index
    %c0_214 = arith.constant 0 : index
    %c0_215 = arith.constant 0 : index
    %239 = vector.load %arg4[%c5_213, %c0_214, %c0_215] : memref<9x24x24xf32, #tpu.memory_space<vmem>>, vector<1x24x24xf32>
    %240 = vector.shape_cast %239 : vector<1x24x24xf32> to vector<24x24xf32>
    %cst_216 = arith.constant dense<0.000000e+00> : vector<2x24xf32>
    %241 = tpu.matmul %238, %240, %cst_216 {dimension_numbers = #tpu.dot_dimension_numbers<[1], [0], [0], [1], [0, 0, 1, 1], [], []>} : vector<2x24xf32>, vector<24x24xf32>, vector<2x24xf32> -> vector<2x24xf32>
    %242 = arith.addf %235, %241 : vector<2x24xf32>
    %c6_217 = arith.constant 6 : index
    %c0_218 = arith.constant 0 : index
    %c0_219 = arith.constant 0 : index
    %243 = vector.load %arg9[%c6_217, %c0_218, %c0_219] : memref<9x2x8xf32, #tpu.memory_space<vmem>>, vector<1x2x8xf32>
    %244 = vector.shape_cast %243 : vector<1x2x8xf32> to vector<2x8xf32>
    %cst_220 = arith.constant dense<0.000000e+00> : vector<2x24xf32>
    %245 = tpu.matmul %244, %201, %cst_220 {dimension_numbers = #tpu.dot_dimension_numbers<[1], [0], [0], [1], [0, 0, 1, 1], [], []>} : vector<2x8xf32>, vector<8x24xf32>, vector<2x24xf32> -> vector<2x24xf32>
    %c6_221 = arith.constant 6 : index
    %c0_222 = arith.constant 0 : index
    %c0_223 = arith.constant 0 : index
    %246 = vector.load %arg4[%c6_221, %c0_222, %c0_223] : memref<9x24x24xf32, #tpu.memory_space<vmem>>, vector<1x24x24xf32>
    %247 = vector.shape_cast %246 : vector<1x24x24xf32> to vector<24x24xf32>
    %cst_224 = arith.constant dense<0.000000e+00> : vector<2x24xf32>
    %248 = tpu.matmul %245, %247, %cst_224 {dimension_numbers = #tpu.dot_dimension_numbers<[1], [0], [0], [1], [0, 0, 1, 1], [], []>} : vector<2x24xf32>, vector<24x24xf32>, vector<2x24xf32> -> vector<2x24xf32>
    %249 = arith.addf %242, %248 : vector<2x24xf32>
    %c7_225 = arith.constant 7 : index
    %c0_226 = arith.constant 0 : index
    %c0_227 = arith.constant 0 : index
    %250 = vector.load %arg9[%c7_225, %c0_226, %c0_227] : memref<9x2x8xf32, #tpu.memory_space<vmem>>, vector<1x2x8xf32>
    %251 = vector.shape_cast %250 : vector<1x2x8xf32> to vector<2x8xf32>
    %cst_228 = arith.constant dense<0.000000e+00> : vector<2x24xf32>
    %252 = tpu.matmul %251, %201, %cst_228 {dimension_numbers = #tpu.dot_dimension_numbers<[1], [0], [0], [1], [0, 0, 1, 1], [], []>} : vector<2x8xf32>, vector<8x24xf32>, vector<2x24xf32> -> vector<2x24xf32>
    %c7_229 = arith.constant 7 : index
    %c0_230 = arith.constant 0 : index
    %c0_231 = arith.constant 0 : index
    %253 = vector.load %arg4[%c7_229, %c0_230, %c0_231] : memref<9x24x24xf32, #tpu.memory_space<vmem>>, vector<1x24x24xf32>
    %254 = vector.shape_cast %253 : vector<1x24x24xf32> to vector<24x24xf32>
    %cst_232 = arith.constant dense<0.000000e+00> : vector<2x24xf32>
    %255 = tpu.matmul %252, %254, %cst_232 {dimension_numbers = #tpu.dot_dimension_numbers<[1], [0], [0], [1], [0, 0, 1, 1], [], []>} : vector<2x24xf32>, vector<24x24xf32>, vector<2x24xf32> -> vector<2x24xf32>
    %256 = arith.addf %249, %255 : vector<2x24xf32>
    %c8_233 = arith.constant 8 : index
    %c0_234 = arith.constant 0 : index
    %c0_235 = arith.constant 0 : index
    %257 = vector.load %arg9[%c8_233, %c0_234, %c0_235] : memref<9x2x8xf32, #tpu.memory_space<vmem>>, vector<1x2x8xf32>
    %258 = vector.shape_cast %257 : vector<1x2x8xf32> to vector<2x8xf32>
    %cst_236 = arith.constant dense<0.000000e+00> : vector<2x24xf32>
    %259 = tpu.matmul %258, %201, %cst_236 {dimension_numbers = #tpu.dot_dimension_numbers<[1], [0], [0], [1], [0, 0, 1, 1], [], []>} : vector<2x8xf32>, vector<8x24xf32>, vector<2x24xf32> -> vector<2x24xf32>
    %c8_237 = arith.constant 8 : index
    %c0_238 = arith.constant 0 : index
    %c0_239 = arith.constant 0 : index
    %260 = vector.load %arg4[%c8_237, %c0_238, %c0_239] : memref<9x24x24xf32, #tpu.memory_space<vmem>>, vector<1x24x24xf32>
    %261 = vector.shape_cast %260 : vector<1x24x24xf32> to vector<24x24xf32>
    %cst_240 = arith.constant dense<0.000000e+00> : vector<2x24xf32>
    %262 = tpu.matmul %259, %261, %cst_240 {dimension_numbers = #tpu.dot_dimension_numbers<[1], [0], [0], [1], [0, 0, 1, 1], [], []>} : vector<2x24xf32>, vector<24x24xf32>, vector<2x24xf32> -> vector<2x24xf32>
    %263 = arith.addf %256, %262 : vector<2x24xf32>
    %cst_241 = arith.constant 0.000000e+00 : f32
    %264 = vector.broadcast %cst_241 : f32 to vector<2x24xf32>
    %265 = arith.maximumf %263, %264 : vector<2x24xf32>
    %cst_242 = arith.constant dense<0.000000e+00> : vector<24xf32>
    %266 = vector.multi_reduction <add>, %265, %cst_242 [0] : vector<2x24xf32> to vector<24xf32>
    %267 = vector.shape_cast %266 : vector<24xf32> to vector<1x24xf32>
    %cst_243 = arith.constant 5.000000e-01 : f32
    %268 = vector.broadcast %cst_243 : f32 to vector<1x24xf32>
    %269 = arith.mulf %267, %268 : vector<1x24xf32>
    %270 = vector.broadcast %269 : vector<1x24xf32> to vector<2x24xf32>
    %271 = arith.subf %265, %270 : vector<2x24xf32>
    %272 = arith.mulf %271, %271 : vector<2x24xf32>
    %cst_244 = arith.constant dense<0.000000e+00> : vector<24xf32>
    %273 = vector.multi_reduction <add>, %272, %cst_244 [0] : vector<2x24xf32> to vector<24xf32>
    %274 = vector.shape_cast %273 : vector<24xf32> to vector<1x24xf32>
    %cst_245 = arith.constant 5.000000e-01 : f32
    %275 = vector.broadcast %cst_245 : f32 to vector<1x24xf32>
    %276 = arith.mulf %274, %275 : vector<1x24xf32>
    %c3_246 = arith.constant 3 : index
    %c0_247 = arith.constant 0 : index
    %277 = vector.load %arg5[%c3_246, %c0_247] : memref<4x24xf32, #tpu.memory_space<vmem>>, vector<1x24xf32>
    %c3_248 = arith.constant 3 : index
    %c0_249 = arith.constant 0 : index
    %278 = vector.load %arg6[%c3_248, %c0_249] : memref<4x24xf32, #tpu.memory_space<vmem>>, vector<1x24xf32>
    %cst_250 = arith.constant 9.99999974E-6 : f32
    %279 = vector.broadcast %cst_250 : f32 to vector<1x24xf32>
    %280 = arith.addf %276, %279 : vector<1x24xf32>
    %281 = math.rsqrt %280 : vector<1x24xf32>
    %282 = arith.mulf %281, %277 : vector<1x24xf32>
    %283 = arith.mulf %269, %282 : vector<1x24xf32>
    %284 = arith.subf %278, %283 : vector<1x24xf32>
    %285 = vector.broadcast %282 : vector<1x24xf32> to vector<2x24xf32>
    %286 = arith.mulf %265, %285 : vector<2x24xf32>
    %287 = vector.broadcast %284 : vector<1x24xf32> to vector<2x24xf32>
    %288 = arith.addf %286, %287 : vector<2x24xf32>
    %c0_251 = arith.constant 0 : index
    %c0_252 = arith.constant 0 : index
    %289 = vector.load %arg10[%c0_251, %c0_252] : memref<2x24xf32, #tpu.memory_space<vmem>>, vector<2x24xf32>
    tpu.vector_store %arg10[%c0_251, %c0_252], %288 {strides = array<i32>} : memref<2x24xf32, #tpu.memory_space<vmem>>, vector<2x24xf32>,
    return
  }
}

</mosaic_0001>

<bundles_post_ra>
// kernel: conv_input_model.1
= control target key start
LH: loop header
LB: loop body
LE: loop exit
PB: predicated region body
PF: predicated region fallthrough
CT: control target
= control target key end

     0   :  { %s3486_s0 = inlined_call_operand.vmem [shape: f32[128,32], index: 0, kind: input, shape index: {}]   ;;  %s3487_s1 = inlined_call_operand.vmem [shape: f32[32,24], index: 1, kind: input, shape index: {}]   ;;  %s3488_s2 = inlined_call_operand.vmem [shape: f32[9,24,24], index: 2, kind: input, shape index: {}]   ;;  %s3489_s3 = inlined_call_operand.vmem [shape: f32[9,24,24], index: 3, kind: input, shape index: {}]   ;;  %s3490_s4 = inlined_call_operand.vmem [shape: f32[9,24,24], index: 4, kind: input, shape index: {}]   ;;  %s3491_s5 = inlined_call_operand.vmem [shape: f32[4,24], index: 5, kind: input, shape index: {}]   ;;  %s3492_s6 = inlined_call_operand.vmem [shape: f32[4,24], index: 6, kind: input, shape index: {}]   ;;  %s3493_s7 = inlined_call_operand.vmem [shape: f32[9,32,128], index: 7, kind: input, shape index: {}]   ;;  %s3494_s8 = inlined_call_operand.vmem [shape: f32[9,8,32], index: 8, kind: input, shape index: {}]   ;;  %s3495_s9 = inlined_call_operand.vmem [shape: f32[9,2,8], index: 9, kind: input, shape index: {}]   ;;  %s3496_s10 = inlined_call_operand.hbm [shape: f32[2,24], index: 10, kind: output, shape index: {}]  }
   0x1   :  { %v55_v0 = vld [vmem:[%s3487_s1 + $0x18] sm:$0xff]  ;;  %v54_v1 = vld [vmem:[%s3487_s1 + $0x10] sm:$0xff]  ;;  %v53_v2 = vld [vmem:[%s3487_s1 + $0x8] sm:$0xff] }
   0x2   :  { %117 = vmatpush.msra.mxu0 %v55_v0 }
   0x4   :  { %118 = vmatpush.msra.mxu0 %v54_v1 }
   0x5   :  { %15 = vsyncpa [#allocation3], 0  ;;  %v52_v3 = vld [vmem:[%s3487_s1] sm:$0xff]  ;;  %vm56_vm0 = vcmask 261120   ;;  %v37_v5 = vld [vmem:[%s3486_s0 + $0x8] sm:$0xff]  ;;  %vm186_vm1 = vcmask 195584  }
   0x6   :  { %119 = vmatpush.msra.mxu0 %v53_v2  ;;  %v36_v4 = vld [vmem:[%s3486_s0] sm:$0xff]  ;;  %v38_v6 = vld [vmem:[%s3486_s0 + $0x10] sm:$0xff]  ;;  %v39_v7 = vld [vmem:[%s3486_s0 + $0x18] sm:$0xff]  ;;  %vm1661_vm11 = vcmask 64512   ;;  %vm2135_vm12 = vcmask 189440   ;;  %s2434_s28 = smov [#allocation2]  }
   0x7   :  { %v40_v8 = vld [vmem:[%s3486_s0 + $0x20] sm:$0xff]  ;;  %v41_v9 = vld [vmem:[%s3486_s0 + $0x28] sm:$0xff]  ;;  %v42_v10 = vld [vmem:[%s3486_s0 + $0x30] sm:$0xff] }
   0x8   :  { %120 = vmatpush.msra.mxu0 %v52_v3  ;;  %v43_v11 = vld [vmem:[%s3486_s0 + $0x38] sm:$0xff]  ;;  %v44_v12 = vld [vmem:[%s3486_s0 + $0x40] sm:$0xff]  ;;  %v45_v13 = vld [vmem:[%s3486_s0 + $0x48] sm:$0xff] }
   0x9   :  { %2191 = vmatmul.msk.f32.vlgmr.msra.gmra.mxu0 %vm56_vm0, %v36_v4  ;;  %v46_v14 = vld [vmem:[%s3486_s0 + $0x50] sm:$0xff]  ;;  %v47_v15 = vld [vmem:[%s3486_s0 + $0x58] sm:$0xff]  ;;  %v48_v16 = vld [vmem:[%s3486_s0 + $0x60] sm:$0xff] }
   0xa   :  { %v49_v17 = vld [vmem:[%s3486_s0 + $0x68] sm:$0xff]  ;;  %v50_v18 = vld [vmem:[%s3486_s0 + $0x70] sm:$0xff]  ;;  %v51_v19 = vld [vmem:[%s3486_s0 + $0x78] sm:$0xff]  ;;  %s2182_s0 = sshll.u32 %s3496_s10, 4  ;;  %s2183_s0 = int_to_ptr.hbm [resolvable:$true] %s2182_s0 }
  0x11   :  { %2192 = vmatmul.msk.f32.gmra.mxu0 %vm56_vm0, %v37_v5 }
  0x19   :  { %2193 = vmatmul.msk.f32.gmra.mxu0 %vm56_vm0, %v38_v6 }
  0x21   :  { %2194 = vmatmul.msk.f32.gmra.mxu0 %vm56_vm0, %v39_v7 }
  0x29   :  { %2195 = vmatmul.msk.f32.gmra.mxu0 %vm56_vm0, %v40_v8 }
  0x31   :  { %2196 = vmatmul.msk.f32.gmra.mxu0 %vm56_vm0, %v41_v9 }
  0x39   :  { %2197 = vmatmul.msk.f32.gmra.mxu0 %vm56_vm0, %v42_v10 }
  0x41   :  { %2198 = vmatmul.msk.f32.gmra.mxu0 %vm56_vm0, %v43_v11 }
  0x49   :  { %2199 = vmatmul.msk.f32.gmra.mxu0 %vm56_vm0, %v44_v12 }
  0x51   :  { %2200 = vmatmul.msk.f32.gmra.mxu0 %vm56_vm0, %v45_v13 }
  0x59   :  { %2201 = vmatmul.msk.f32.gmra.mxu0 %vm56_vm0, %v46_v14 }
  0x61   :  { %2202 = vmatmul.msk.f32.gmra.mxu0 %vm56_vm0, %v47_v15 }
  0x69   :  { %2203 = vmatmul.msk.f32.gmra.mxu0 %vm56_vm0, %v48_v16 }
  0x71   :  { %2204 = vmatmul.msk.f32.gmra.mxu0 %vm56_vm0, %v49_v17 }
  0x79   :  { %2205 = vmatmul.msk.f32.gmra.mxu0 %vm56_vm0, %v50_v18 }
  0x81   :  { %2206 = vmatmul.msk.f32.gmra.mxu0 %vm56_vm0, %v51_v19 }
  0x86   :  { %v122_v20 = vpop.f32.mrf.mxu0 }
  0x87   :  { %v2568_v33 = vmax.f32 %v122_v20, 0.0 }
  0x89   :  { %v187_v37 = vsel %vm186_vm1, %v2568_v33, 0.0 }
  0x8e   :  { %v125_v21 = vpop.f32.mrf.mxu0 }
  0x8f   :  { %v2566_v32 = vmax.f32 %v125_v21, 0.0 }
  0x91   :  { %v188_v35 = vsel %vm186_vm1, %v2566_v32, 0.0 }
  0x92   :  { %v189_v40 = vadd.f32 %v188_v35, %v187_v37 }
  0x96   :  { %v128_v22 = vpop.f32.mrf.mxu0 }
  0x97   :  { %v2570_v34 = vmax.f32 %v128_v22, 0.0 }
  0x99   :  { %v190_v38 = vsel %vm186_vm1, %v2570_v34, 0.0 }
  0x9a   :  { %v191_v44 = vadd.f32 %v190_v38, %v189_v40 }
  0x9e   :  { %v131_v23 = vpop.f32.mrf.mxu0 }
  0x9f   :  { %v2574_v36 = vmax.f32 %v131_v23, 0.0 }
  0xa1   :  { %v192_v42 = vsel %vm186_vm1, %v2574_v36, 0.0 }
  0xa2   :  { %v193_v47 = vadd.f32 %v192_v42, %v191_v44 }
  0xa6   :  { %v134_v24 = vpop.f32.mrf.mxu0 }
  0xa7   :  { %v2580_v39 = vmax.f32 %v134_v24, 0.0 }
  0xa9   :  { %v194_v45 = vsel %vm186_vm1, %v2580_v39, 0.0 }
  0xaa   :  { %v195_v50 = vadd.f32 %v194_v45, %v193_v47 }
  0xae   :  { %v137_v25 = vpop.f32.mrf.mxu0 }
  0xaf   :  { %v2584_v43 = vmax.f32 %v137_v25, 0.0 }
  0xb1   :  { %v196_v48 = vsel %vm186_vm1, %v2584_v43, 0.0 }
  0xb2   :  { %v197_v53 = vadd.f32 %v196_v48, %v195_v50 }
  0xb6   :  { %v140_v26 = vpop.f32.mrf.mxu0 }
  0xb7   :  { %v2588_v46 = vmax.f32 %v140_v26, 0.0 }
  0xb9   :  { %v198_v51 = vsel %vm186_vm1, %v2588_v46, 0.0 }
  0xba   :  { %v199_v57 = vadd.f32 %v198_v51, %v197_v53 }
  0xbe   :  { %v143_v27 = vpop.f32.mrf.mxu0 }
  0xbf   :  { %v2592_v49 = vmax.f32 %v143_v27, 0.0 }
  0xc1   :  { %v200_v55 = vsel %vm186_vm1, %v2592_v49, 0.0 }
  0xc2   :  { %v201_v60 = vadd.f32 %v200_v55, %v199_v57 }
  0xc6   :  { %v146_v28 = vpop.f32.mrf.mxu0 }
  0xc7   :  { %v2596_v52 = vmax.f32 %v146_v28, 0.0 }
  0xc9   :  { %v202_v58 = vsel %vm186_vm1, %v2596_v52, 0.0 }
  0xca   :  { %v203_v63 = vadd.f32 %v202_v58, %v201_v60 }
  0xce   :  { %v149_v29 = vpop.f32.mrf.mxu0 }
  0xcf   :  { %v2600_v56 = vmax.f32 %v149_v29, 0.0 }
  0xd1   :  { %v204_v61 = vsel %vm186_vm1, %v2600_v56, 0.0 }
  0xd2   :  { %v205_v2 = vadd.f32 %v204_v61, %v203_v63 }
  0xd6   :  { %v152_v30 = vpop.f32.mrf.mxu0 }
  0xd7   :  { %v2604_v59 = vmax.f32 %v152_v30, 0.0 }
  0xd9   :  { %v206_v0 = vsel %vm186_vm1, %v2604_v59, 0.0 }
  0xda   :  { %v207_v6 = vadd.f32 %v206_v0, %v205_v2 }
  0xde   :  { %v155_v31 = vpop.f32.mrf.mxu0 }
  0xdf   :  { %v2608_v62 = vmax.f32 %v155_v31, 0.0 }
  0xe1   :  { %v208_v4 = vsel %vm186_vm1, %v2608_v62, 0.0 }
  0xe2   :  { %v209_v9 = vadd.f32 %v208_v4, %v207_v6 }
  0xe6   :  { %v158_v41 = vpop.f32.mrf.mxu0 }
  0xe7   :  { %v2612_v1 = vmax.f32 %v158_v41, 0.0 }
  0xe9   :  { %v210_v7 = vsel %vm186_vm1, %v2612_v1, 0.0 }
  0xea   :  { %v211_v11 = vadd.f32 %v210_v7, %v209_v9 }
  0xee   :  { %v161_v54 = vpop.f32.mrf.mxu0 }
  0xef   :  { %v2616_v5 = vmax.f32 %v161_v54, 0.0 }
  0xf1   :  { %v212_v10 = vsel %vm186_vm1, %v2616_v5, 0.0 }
  0xf2   :  { %v213_v13 = vadd.f32 %v212_v10, %v211_v11 }
  0xf6   :  { %v164_v3 = vpop.f32.mrf.mxu0 }
  0xf7   :  { %v2620_v8 = vmax.f32 %v164_v3, 0.0 }
  0xf9   :  { %v214_v12 = vsel %vm186_vm1, %v2620_v8, 0.0 }
  0xfa   :  { %v215_v16 = vadd.f32 %v214_v12, %v213_v13 }
  0xfe   :  { %v167_v14 = vpop.f32.mrf.mxu0 }
  0xff   :  { %v2626_v15 = vmax.f32 %v167_v14, 0.0 }
 0x101   :  { %v216_v17 = vsel %vm186_vm1, %v2626_v15, 0.0 }
 0x102   :  { %v217_v18 = vadd.f32 %v216_v17, %v215_v16 }
 0x104   :  { %v218_v19 = vrot.slane %v217_v18, 4 }
 0x106   :  { %v219_v20 = vadd.f32 %v218_v19, %v217_v18 }
 0x108   :  { %v220_v21 = vrot.slane %v219_v20, 2 }
 0x10a   :  { %v221_v22 = vadd.f32 %v220_v21, %v219_v20 }
 0x10c   :  { %v222_v23 = vrot.slane %v221_v22, 1 }
 0x10e   :  { %v223_v24 = vadd.f32 %v222_v23, %v221_v22 }
 0x110   :  { %v2630_v25 = vmul.f32 0.0078125, %v223_v24 }
 0x112   :  { %v225_v26 = vsub.f32 %v2568_v33, %v2630_v25  ;;  %v226_v27 = vsub.f32 %v2566_v32, %v2630_v25  ;;  %v227_v28 = vsub.f32 %v2570_v34, %v2630_v25  ;;  %v228_v29 = vsub.f32 %v2574_v36, %v2630_v25 }
 0x113   :  { %v229_v35 = vsub.f32 %v2580_v39, %v2630_v25  ;;  %v230_v38 = vsub.f32 %v2584_v43, %v2630_v25  ;;  %v231_v45 = vsub.f32 %v2588_v46, %v2630_v25  ;;  %v232_v51 = vsub.f32 %v2592_v49, %v2630_v25 }
 0x114   :  { %v241_v30 = vmul.f32 %v225_v26, %v225_v26  ;;  %v242_v31 = vmul.f32 %v226_v27, %v226_v27  ;;  %v243_v37 = vmul.f32 %v227_v28, %v227_v28  ;;  %v244_v40 = vmul.f32 %v228_v29, %v228_v29 }
 0x115   :  { %v245_v47 = vmul.f32 %v229_v35, %v229_v35  ;;  %v246_v53 = vmul.f32 %v230_v38, %v230_v38  ;;  %v233_v57 = vsub.f32 %v2596_v52, %v2630_v25  ;;  %v247_v58 = vmul.f32 %v231_v45, %v231_v45 }
 0x116   :  { %v257_v41 = vsel %vm186_vm1, %v241_v30, 0.0  ;;  %v258_v42 = vsel %vm186_vm1, %v242_v31, 0.0  ;;  %v260_v48 = vsel %vm186_vm1, %v243_v37, 0.0  ;;  %v262_v54 = vsel %vm186_vm1, %v244_v40, 0.0 }
 0x117   :  { %v259_v44 = vadd.f32 %v258_v42, %v257_v41  ;;  %v264_v60 = vsel %vm186_vm1, %v245_v47, 0.0  ;;  %v234_v63 = vsub.f32 %v2600_v56, %v2630_v25  ;;  %v248_v0 = vmul.f32 %v232_v51, %v232_v51 }
 0x118   :  { %v266_v2 = vsel %vm186_vm1, %v246_v53, 0.0  ;;  %v235_v4 = vsub.f32 %v2604_v59, %v2630_v25  ;;  %v249_v6 = vmul.f32 %v233_v57, %v233_v57  ;;  %v268_v7 = vsel %vm186_vm1, %v247_v58, 0.0 }
 0x119   :  { %v261_v50 = vadd.f32 %v260_v48, %v259_v44  ;;  %v236_v10 = vsub.f32 %v2608_v62, %v2630_v25  ;;  %v250_v11 = vmul.f32 %v234_v63, %v234_v63  ;;  %v270_v12 = vsel %vm186_vm1, %v248_v0, 0.0 }
 0x11a   :  { %v237_v14 = vsub.f32 %v2612_v1, %v2630_v25  ;;  %v251_v16 = vmul.f32 %v235_v4, %v235_v4  ;;  %v272_v17 = vsel %vm186_vm1, %v249_v6, 0.0  ;;  %v238_v19 = vsub.f32 %v2616_v5, %v2630_v25  ;;  %v295_v4 = vld [vmem:[%s3491_s5] sm:$0x1] }
 0x11b   :  { %v263_v55 = vadd.f32 %v262_v54, %v261_v50  ;;  %v252_v20 = vmul.f32 %v236_v10, %v236_v10  ;;  %v274_v21 = vsel %vm186_vm1, %v250_v11, 0.0  ;;  %v239_v23 = vsub.f32 %v2620_v8, %v2630_v25  ;;  %v296_v10 = vld [vmem:[%s3492_s6] sm:$0x1] }
 0x11c   :  { %v253_v24 = vmul.f32 %v237_v14, %v237_v14  ;;  %v276_v26 = vsel %vm186_vm1, %v251_v16, 0.0  ;;  %v240_v28 = vsub.f32 %v2626_v15, %v2630_v25  ;;  %v254_v29 = vmul.f32 %v238_v19, %v238_v19 }
 0x11d   :  { %v265_v61 = vadd.f32 %v264_v60, %v263_v55  ;;  %v278_v30 = vsel %vm186_vm1, %v252_v20, 0.0  ;;  %v255_v35 = vmul.f32 %v239_v23, %v239_v23 }
 0x11e   :  { %v280_v37 = vsel %vm186_vm1, %v253_v24, 0.0  ;;  %v256_v40 = vmul.f32 %v240_v28, %v240_v28  ;;  %v282_v41 = vsel %vm186_vm1, %v254_v29, 0.0 }
 0x11f   :  { %v267_v3 = vadd.f32 %v266_v2, %v265_v61  ;;  %v284_v44 = vsel %vm186_vm1, %v255_v35, 0.0 }
 0x120   :  { %v286_v47 = vsel %vm186_vm1, %v256_v40, 0.0  ;;  %v2228_v40 = vld [vmem:[%s3488_s2 + $0x40] sm:$0xff] }
 0x121   :  { %v269_v9 = vadd.f32 %v268_v7, %v267_v3 }
 0x123   :  { %v271_v13 = vadd.f32 %v270_v12, %v269_v9 }
 0x125   :  { %v273_v18 = vadd.f32 %v272_v17, %v271_v13 }
 0x127   :  { %v275_v22 = vadd.f32 %v274_v21, %v273_v18 }
 0x129   :  { %v277_v27 = vadd.f32 %v276_v26, %v275_v22 }
 0x12b   :  { %v279_v31 = vadd.f32 %v278_v30, %v277_v27 }
 0x12d   :  { %v281_v38 = vadd.f32 %v280_v37, %v279_v31 }
 0x12f   :  { %v283_v42 = vadd.f32 %v282_v41, %v281_v38  ;;  %v345_v38 = vld [vmem:[%s3493_s7] sm:$0xff]  ;;  %v2226_v41 = vld [vmem:[%s3488_s2 + $0x30] sm:$0xff] }
 0x131   :  { %v285_v45 = vadd.f32 %v284_v44, %v283_v42  ;;  %v346_v42 = vld [vmem:[%s3493_s7 + $0x8] sm:$0xff] }
 0x132   :  { %v2208_v44 = vld [vmem:[%s3493_s7 + $0x28] sm:$0xff] }
 0x133   :  { %v287_v48 = vadd.f32 %v286_v47, %v285_v45  ;;  %v347_v45 = vld [vmem:[%s3493_s7 + $0x10] sm:$0xff] }
 0x134   :  { %v2209_v47 = vld [vmem:[%s3493_s7 + $0x30] sm:$0xff] }
 0x135   :  { %v288_v50 = vrot.slane %v287_v48, 4 }
 0x137   :  { %v289_v51 = vadd.f32 %v288_v50, %v287_v48  ;;  %v348_v48 = vld [vmem:[%s3493_s7 + $0x18] sm:$0xff] }
 0x138   :  { %v2210_v50 = vld [vmem:[%s3493_s7 + $0x38] sm:$0xff] }
 0x139   :  { %v290_v53 = vrot.slane %v289_v51, 2 }
 0x13b   :  { %v291_v54 = vadd.f32 %v290_v53, %v289_v51  ;;  %v2239_v51 = vld [vmem:[%s3488_s2 + $0x58] sm:$0xff]  ;;  %v2222_v53 = vld [vmem:[%s3493_s7 + $0x40] sm:$0xff] }
 0x13d   :  { %v292_v55 = vrot.slane %v291_v54, 1 }
 0x13f   :  { %v293_v57 = vadd.f32 %v292_v55, %v291_v54  ;;  %v2238_v54 = vld [vmem:[%s3488_s2 + $0x50] sm:$0xff]  ;;  %v2237_v55 = vld [vmem:[%s3488_s2 + $0x48] sm:$0xff] }
 0x141   :  { %v294_v58 = vmul.f32 0.0078125, %v293_v57  ;;  %v2213_v57 = vld [vmem:[%s3488_s2 + $0x28] sm:$0xff] }
 0x142   :  { %444 = vmatpush.msra.mxu3 %v2213_v57  ;;  %v2289_v57 = vld [vmem:[%s3493_s7 + $0x108] sm:$0xff] }
 0x143   :  { %v297_v60 = vadd.f32 1e-05, %v294_v58  ;;  %v2212_v58 = vld [vmem:[%s3488_s2 + $0x20] sm:$0xff] }
 0x144   :  { %445 = vmatpush.msra.mxu3 %v2212_v58  ;;  %v2278_v58 = vld [vmem:[%s3493_s7 + $0xe8] sm:$0xff] }
 0x145   :  { %2400 = vrsqrt.f32 %v297_v60  ;;  %vm304_vm3 = vweird.f32 %v297_v60 }
 0x14b   :  { %v2401_v61 = vpop.eup %2400 }
 0x14c   :  { %v299_v63 = vmul.f32 %v2401_v61, %v297_v60  ;;  %vm305_vm2 = vweird.f32 %v2401_v61  ;;  %v2223_v60 = vld [vmem:[%s3493_s7 + $0x48] sm:$0xff] }
 0x14d   :  { %vm306_vm4 = vmor %vm304_vm3, %vm305_vm2 }
 0x14e   :  { %v300_v0 = vmul.f32 %v2401_v61, %v299_v63  ;;  %v2225_v63 = vld [vmem:[%s3493_s7 + $0x58] sm:$0xff] }
 0x150   :  { %v301_v2 = vmul.f32 0.5, %v300_v0  ;;  %v2211_v0 = vld [vmem:[%s3488_s2 + $0x18] sm:$0xff] }
 0x151   :  { %446 = vmatpush.msra.mxu3 %v2211_v0  ;;  %v2280_v0 = vld [vmem:[%s3493_s7 + $0xf8] sm:$0xff] }
 0x152   :  { %v302_v3 = vsub.f32 1.5, %v301_v2  ;;  %v380_v2 = vld [vmem:[%s3488_s2 + $0x10] sm:$0xff] }
 0x153   :  { %485 = vmatpush.msrb.mxu3 %v380_v2  ;;  %v2270_v2 = vld [vmem:[%s3488_s2 + $0x90] sm:$0xff] }
 0x154   :  { %v303_v6 = vmul.f32 %v2401_v61, %v302_v3  ;;  %v379_v3 = vld [vmem:[%s3488_s2 + $0x8] sm:$0xff] }
 0x155   :  { %486 = vmatpush.msrb.mxu3 %v379_v3 }
 0x156   :  { %v307_v7 = vsel %vm306_vm4, %v2401_v61, %v303_v6  ;;  %v2224_v61 = vld [vmem:[%s3493_s7 + $0x50] sm:$0xff] }
 0x157   :  { %v308_v9 = vmul.f32 %v307_v7, %v295_v4  ;;  %v378_v4 = vld [vmem:[%s3488_s2] sm:$0xff] }
 0x158   :  { %487 = vmatpush.msrb.mxu3 %v378_v4  ;;  %v2261_v4 = vld [vmem:[%s3488_s2 + $0x88] sm:$0xff] }
 0x159   :  { %v309_v11 = vmul.f32 %v308_v9, %v2630_v25  ;;  %v311_v12 = vperm.slane %v308_v9, 0 }
 0x15b   :  { %v310_v13 = vsub.f32 %v296_v10, %v309_v11  ;;  %v327_v14 = vmul.f32 %v311_v12, %v2626_v15  ;;  %v326_v18 = vmul.f32 %v311_v12, %v2620_v8  ;;  %v325_v20 = vmul.f32 %v311_v12, %v2616_v5 }
 0x15c   :  { %v324_v15 = vmul.f32 %v311_v12, %v2612_v1  ;;  %v323_v21 = vmul.f32 %v311_v12, %v2608_v62  ;;  %v322_v22 = vmul.f32 %v311_v12, %v2604_v59  ;;  %v321_v23 = vmul.f32 %v311_v12, %v2600_v56 }
 0x15d   :  { %v328_v16 = vperm.slane %v310_v13, 0  ;;  %v320_v24 = vmul.f32 %v311_v12, %v2596_v52  ;;  %v319_v26 = vmul.f32 %v311_v12, %v2592_v49  ;;  %v318_v27 = vmul.f32 %v311_v12, %v2588_v46 }
 0x15e   :  { %v317_v28 = vmul.f32 %v311_v12, %v2584_v43  ;;  %v316_v29 = vmul.f32 %v311_v12, %v2580_v39  ;;  %v315_v30 = vmul.f32 %v311_v12, %v2574_v36  ;;  %v314_v31 = vmul.f32 %v311_v12, %v2570_v34 }
 0x15f   :  { %v2688_v17 = vadd.f32 %v328_v16, %v327_v14  ;;  %v2693_v19 = vadd.f32 %v328_v16, %v326_v18  ;;  %v2698_v25 = vadd.f32 %v328_v16, %v325_v20  ;;  %v2703_v8 = vadd.f32 %v328_v16, %v324_v15  ;;  %v2250_v18 = vld [vmem:[%s3488_s2 + $0x70] sm:$0xff]  ;;  %v2249_v20 = vld [vmem:[%s3488_s2 + $0x68] sm:$0xff] }
 0x160   :  { %v2708_v5 = vadd.f32 %v328_v16, %v323_v21  ;;  %v2713_v1 = vadd.f32 %v328_v16, %v322_v22  ;;  %v2718_v62 = vadd.f32 %v328_v16, %v321_v23  ;;  %v2723_v59 = vadd.f32 %v328_v16, %v320_v24  ;;  %v2248_v21 = vld [vmem:[%s3488_s2 + $0x60] sm:$0xff] }
 0x161   :  { %349 = vmatpush.msra.mxu1 %v2688_v17  ;;  %386 = vmatpush.msra.mxu2 %v2688_v17  ;;  %v2728_v56 = vadd.f32 %v328_v16, %v319_v26  ;;  %v2733_v52 = vadd.f32 %v328_v16, %v318_v27  ;;  %v2738_v49 = vadd.f32 %v328_v16, %v317_v28  ;;  %v2244_v24 = vld [vmem:[%s3493_s7 + $0x80] sm:$0xff]  ;;  %v2245_v27 = vld [vmem:[%s3493_s7 + $0x88] sm:$0xff] }
 0x162   :  { %v2743_v46 = vadd.f32 %v328_v16, %v316_v29  ;;  %v2748_v43 = vadd.f32 %v328_v16, %v315_v30  ;;  %v2753_v39 = vadd.f32 %v328_v16, %v314_v31  ;;  %v313_v35 = vmul.f32 %v311_v12, %v2566_v32  ;;  %v2207_v32 = vld [vmem:[%s3493_s7 + $0x20] sm:$0xff]  ;;  %v2234_v28 = vld [vmem:[%s3493_s7 + $0x68] sm:$0xff]  ;;  %v2246_v29 = vld [vmem:[%s3493_s7 + $0x90] sm:$0xff] }
 0x163   :  { %350 = vmatpush.msra.mxu1 %v2693_v19  ;;  %387 = vmatpush.msra.mxu2 %v2693_v19  ;;  %v312_v37 = vmul.f32 %v311_v12, %v2568_v33  ;;  %v2227_v33 = vld [vmem:[%s3488_s2 + $0x38] sm:$0xff]  ;;  %v2233_v26 = vld [vmem:[%s3493_s7 + $0x60] sm:$0xff]  ;;  %v2235_v30 = vld [vmem:[%s3493_s7 + $0x70] sm:$0xff] }
 0x164   :  { %v2758_v36 = vadd.f32 %v328_v16, %v313_v35  ;;  %v2247_v31 = vld [vmem:[%s3493_s7 + $0x98] sm:$0xff] }
 0x165   :  { %351 = vmatpush.msra.mxu1 %v2698_v25  ;;  %388 = vmatpush.msra.mxu2 %v2698_v25  ;;  %v2763_v34 = vadd.f32 %v328_v16, %v312_v37  ;;  %v2236_v35 = vld [vmem:[%s3493_s7 + $0x78] sm:$0xff] }
 0x167   :  { %352 = vmatpush.msra.mxu1 %v2703_v8  ;;  %389 = vmatpush.msra.mxu2 %v2703_v8 }
 0x169   :  { %353 = vmatpush.msra.mxu1 %v2708_v5  ;;  %390 = vmatpush.msra.mxu2 %v2708_v5 }
 0x16b   :  { %354 = vmatpush.msra.mxu1 %v2713_v1  ;;  %391 = vmatpush.msra.mxu2 %v2713_v1 }
 0x16d   :  { %355 = vmatpush.msra.mxu1 %v2718_v62  ;;  %392 = vmatpush.msra.mxu2 %v2718_v62 }
 0x16f   :  { %356 = vmatpush.msra.mxu1 %v2723_v59  ;;  %393 = vmatpush.msra.mxu2 %v2723_v59 }
 0x171   :  { %357 = vmatpush.msra.mxu1 %v2728_v56  ;;  %394 = vmatpush.msra.mxu2 %v2728_v56 }
 0x173   :  { %358 = vmatpush.msra.mxu1 %v2733_v52  ;;  %395 = vmatpush.msra.mxu2 %v2733_v52 }
 0x175   :  { %359 = vmatpush.msra.mxu1 %v2738_v49  ;;  %396 = vmatpush.msra.mxu2 %v2738_v49 }
 0x177   :  { %360 = vmatpush.msra.mxu1 %v2743_v46  ;;  %397 = vmatpush.msra.mxu2 %v2743_v46 }
 0x179   :  { %361 = vmatpush.msra.mxu1 %v2748_v43  ;;  %398 = vmatpush.msra.mxu2 %v2748_v43 }
 0x17b   :  { %362 = vmatpush.msra.mxu1 %v2753_v39  ;;  %399 = vmatpush.msra.mxu2 %v2753_v39 }
 0x17d   :  { %363 = vmatpush.msra.mxu1 %v2758_v36  ;;  %400 = vmatpush.msra.mxu2 %v2758_v36 }
 0x17f   :  { %364 = vmatpush.msra.mxu1 %v2763_v34  ;;  %401 = vmatpush.msra.mxu2 %v2763_v34 }
 0x180   :  { %365 = vmatmul.f32.vlgmr.msra.gmra.mxu1 %v345_v38  ;;  %402 = vmatmul.f32.vlgmr.msra.gmra.mxu2 %v2207_v32 }
 0x181   :  { %506 = vmatpush.msrb.mxu1 %v2688_v17  ;;  %564 = vmatpush.msrb.mxu2 %v2228_v40 }
 0x183   :  { %507 = vmatpush.msrb.mxu1 %v2693_v19  ;;  %565 = vmatpush.msrb.mxu2 %v2227_v33 }
 0x185   :  { %508 = vmatpush.msrb.mxu1 %v2698_v25  ;;  %566 = vmatpush.msrb.mxu2 %v2226_v41 }
 0x187   :  { %672 = vmatpush.msra.mxu2 %v2688_v17  ;;  %509 = vmatpush.msrb.mxu1 %v2703_v8 }
 0x188   :  { %368 = vmatmul.f32.gmra.mxu1 %v346_v42  ;;  %405 = vmatmul.f32.gmra.mxu2 %v2208_v44 }
 0x189   :  { %673 = vmatpush.msra.mxu2 %v2693_v19  ;;  %510 = vmatpush.msrb.mxu1 %v2708_v5 }
 0x18b   :  { %674 = vmatpush.msra.mxu2 %v2698_v25  ;;  %511 = vmatpush.msrb.mxu1 %v2713_v1 }
 0x18d   :  { %675 = vmatpush.msra.mxu2 %v2703_v8  ;;  %512 = vmatpush.msrb.mxu1 %v2718_v62 }
 0x18f   :  { %676 = vmatpush.msra.mxu2 %v2708_v5  ;;  %513 = vmatpush.msrb.mxu1 %v2723_v59 }
 0x190   :  { %371 = vmatmul.f32.gmra.mxu1 %v347_v45  ;;  %408 = vmatmul.f32.gmra.mxu2 %v2209_v47 }
 0x191   :  { %677 = vmatpush.msra.mxu2 %v2713_v1  ;;  %514 = vmatpush.msrb.mxu1 %v2728_v56 }
 0x193   :  { %678 = vmatpush.msra.mxu2 %v2718_v62  ;;  %515 = vmatpush.msrb.mxu1 %v2733_v52 }
 0x195   :  { %679 = vmatpush.msra.mxu2 %v2723_v59  ;;  %516 = vmatpush.msrb.mxu1 %v2738_v49 }
 0x197   :  { %680 = vmatpush.msra.mxu2 %v2728_v56  ;;  %517 = vmatpush.msrb.mxu1 %v2743_v46 }
 0x198   :  { %374 = vmatmul.f32.gmra.mxu1 %v348_v48  ;;  %411 = vmatmul.f32.gmra.mxu2 %v2210_v50 }
 0x199   :  { %681 = vmatpush.msra.mxu2 %v2733_v52  ;;  %518 = vmatpush.msrb.mxu1 %v2748_v43 }
 0x19b   :  { %682 = vmatpush.msra.mxu2 %v2738_v49  ;;  %519 = vmatpush.msrb.mxu1 %v2753_v39 }
 0x19d   :  { %683 = vmatpush.msra.mxu2 %v2743_v46  ;;  %520 = vmatpush.msrb.mxu1 %v2758_v36 }
 0x19f   :  { %684 = vmatpush.msra.mxu2 %v2748_v43  ;;  %521 = vmatpush.msrb.mxu1 %v2763_v34 }
 0x1a0   :  { %522 = vmatmul.f32.vlgmr.msrb.gmra.mxu1 %v2222_v53 }
 0x1a1   :  { %647 = vmatpush.msra.mxu1 %v2239_v51  ;;  %685 = vmatpush.msra.mxu2 %v2753_v39 }
 0x1a3   :  { %648 = vmatpush.msra.mxu1 %v2238_v54  ;;  %686 = vmatpush.msra.mxu2 %v2758_v36 }
 0x1a5   :  { %649 = vmatpush.msra.mxu1 %v2237_v55  ;;  %687 = vmatpush.msra.mxu2 %v2763_v34 }
 0x1a7   :  { %755 = vmatpush.msrb.mxu1 %v2688_v17 }
 0x1a8   :  { %525 = vmatmul.f32.gmra.mxu1 %v2223_v60  ;;  %v2290_v60 = vld [vmem:[%s3493_s7 + $0x110] sm:$0xff] }
 0x1a9   :  { %756 = vmatpush.msrb.mxu1 %v2693_v19 }
 0x1ab   :  { %757 = vmatpush.msrb.mxu1 %v2698_v25 }
 0x1ad   :  { %758 = vmatpush.msrb.mxu1 %v2703_v8 }
 0x1af   :  { %759 = vmatpush.msrb.mxu1 %v2708_v5 }
 0x1b0   :  { %528 = vmatmul.f32.gmra.mxu1 %v2224_v61  ;;  %v2279_v61 = vld [vmem:[%s3493_s7 + $0xf0] sm:$0xff] }
 0x1b1   :  { %760 = vmatpush.msrb.mxu1 %v2713_v1 }
 0x1b3   :  { %761 = vmatpush.msrb.mxu1 %v2718_v62 }
 0x1b5   :  { %762 = vmatpush.msrb.mxu1 %v2723_v59 }
 0x1b7   :  { %763 = vmatpush.msrb.mxu1 %v2728_v56 }
 0x1b8   :  { %531 = vmatmul.f32.gmra.mxu1 %v2225_v63  ;;  %v2291_v63 = vld [vmem:[%s3493_s7 + $0x118] sm:$0xff] }
 0x1b9   :  { %764 = vmatpush.msrb.mxu1 %v2733_v52 }
 0x1bb   :  { %765 = vmatpush.msrb.mxu1 %v2738_v49 }
 0x1bd   :  { %766 = vmatpush.msrb.mxu1 %v2743_v46 }
 0x1bf   :  { %767 = vmatpush.msrb.mxu1 %v2748_v43 }
 0x1c1   :  { %768 = vmatpush.msrb.mxu1 %v2753_v39 }
 0x1c3   :  { %769 = vmatpush.msrb.mxu1 %v2758_v36 }
 0x1c5   :  { %770 = vmatpush.msrb.mxu1 %v2763_v34 }
 0x1fd   :  { %v366_v6 = vpop.f32.mrf.mxu1 }
 0x203   :  { %v403_v7 = vpop.f32.mrf.mxu2 }
 0x204   :  { %2214 = vmatmul.msk.f32.vlgmr.msra.gmra.mxu3 %vm186_vm1, %v403_v7 }
 0x205   :  { %589 = vmatpush.msra.mxu3 %v2688_v17  ;;  %v369_v9 = vpop.f32.mrf.mxu1 }
 0x207   :  { %590 = vmatpush.msra.mxu3 %v2693_v19 }
 0x209   :  { %591 = vmatpush.msra.mxu3 %v2698_v25 }
 0x20b   :  { %592 = vmatpush.msra.mxu3 %v2703_v8  ;;  %v406_v10 = vpop.f32.mrf.mxu2 }
 0x20c   :  { %2215 = vmatmul.msk.f32.gmra.mxu3 %vm186_vm1, %v406_v10 }
 0x20d   :  { %v372_v11 = vpop.f32.mrf.mxu1  ;;  %593 = vmatpush.msra.mxu3 %v2708_v5 }
 0x20f   :  { %594 = vmatpush.msra.mxu3 %v2713_v1 }
 0x211   :  { %595 = vmatpush.msra.mxu3 %v2718_v62 }
 0x213   :  { %596 = vmatpush.msra.mxu3 %v2723_v59  ;;  %v409_v12 = vpop.f32.mrf.mxu2 }
 0x214   :  { %2216 = vmatmul.msk.f32.gmra.mxu3 %vm186_vm1, %v409_v12 }
 0x215   :  { %v375_v13 = vpop.f32.mrf.mxu1  ;;  %597 = vmatpush.msra.mxu3 %v2728_v56 }
 0x217   :  { %598 = vmatpush.msra.mxu3 %v2733_v52 }
 0x219   :  { %599 = vmatpush.msra.mxu3 %v2738_v49 }
 0x21b   :  { %600 = vmatpush.msra.mxu3 %v2743_v46  ;;  %v412_v14 = vpop.f32.mrf.mxu2 }
 0x21c   :  { %2217 = vmatmul.msk.f32.gmra.mxu3 %vm186_vm1, %v412_v14 }
 0x21d   :  { %601 = vmatpush.msra.mxu3 %v2748_v43  ;;  %v523_v16 = vpop.f32.mrf.mxu1 }
 0x21e   :  { %2229 = vmatmul.msk.f32.vlgmr.msrb.gmra.mxu2 %vm186_vm1, %v523_v16 }
 0x21f   :  { %602 = vmatpush.msra.mxu3 %v2753_v39  ;;  %813 = vmatpush.msrb.mxu2 %v2261_v4 }
 0x221   :  { %603 = vmatpush.msra.mxu3 %v2758_v36 }
 0x223   :  { %604 = vmatpush.msra.mxu3 %v2763_v34 }
 0x224   :  { %2218 = vmatmul.msk.f32.vlgmr.msrb.gmra.mxu3 %vm186_vm1, %v366_v6  ;;  %v2260_v6 = vld [vmem:[%s3488_s2 + $0x80] sm:$0xff] }
 0x225   :  { %v526_v15 = vpop.f32.mrf.mxu1  ;;  %730 = vmatpush.msrb.mxu3 %v2250_v18  ;;  %814 = vmatpush.msrb.mxu2 %v2260_v6 }
 0x226   :  { %2230 = vmatmul.msk.f32.gmra.mxu2 %vm186_vm1, %v526_v15 }
 0x227   :  { %731 = vmatpush.msrb.mxu3 %v2249_v20 }
 0x229   :  { %732 = vmatpush.msrb.mxu3 %v2248_v21 }
 0x22c   :  { %2219 = vmatmul.msk.f32.gmra.mxu3 %vm186_vm1, %v369_v9 }
 0x22d   :  { %v529_v22 = vpop.f32.mrf.mxu1 }
 0x22e   :  { %2231 = vmatmul.msk.f32.gmra.mxu2 %vm186_vm1, %v529_v22 }
 0x234   :  { %2220 = vmatmul.msk.f32.gmra.mxu3 %vm186_vm1, %v372_v11  ;;  %v2259_v11 = vld [vmem:[%s3488_s2 + $0x78] sm:$0xff] }
 0x235   :  { %v532_v23 = vpop.f32.mrf.mxu1  ;;  %815 = vmatpush.msrb.mxu2 %v2259_v11 }
 0x236   :  { %2232 = vmatmul.msk.f32.gmra.mxu2 %vm186_vm1, %v532_v23 }
 0x23c   :  { %2221 = vmatmul.msk.f32.gmra.mxu3 %vm186_vm1, %v375_v13 }
 0x23e   :  { %688 = vmatmul.f32.vlgmr.msra.gmra.mxu2 %v2244_v24 }
 0x244   :  { %605 = vmatmul.f32.vlgmr.msra.gmra.mxu3 %v2233_v26 }
 0x245   :  { %838 = vmatpush.msra.mxu3 %v2688_v17 }
 0x246   :  { %691 = vmatmul.f32.gmra.mxu2 %v2245_v27 }
 0x247   :  { %839 = vmatpush.msra.mxu3 %v2693_v19 }
 0x249   :  { %840 = vmatpush.msra.mxu3 %v2698_v25 }
 0x24b   :  { %841 = vmatpush.msra.mxu3 %v2703_v8 }
 0x24c   :  { %608 = vmatmul.f32.gmra.mxu3 %v2234_v28 }
 0x24d   :  { %842 = vmatpush.msra.mxu3 %v2708_v5 }
 0x24e   :  { %694 = vmatmul.f32.gmra.mxu2 %v2246_v29 }
 0x24f   :  { %843 = vmatpush.msra.mxu3 %v2713_v1 }
 0x251   :  { %844 = vmatpush.msra.mxu3 %v2718_v62 }
 0x253   :  { %845 = vmatpush.msra.mxu3 %v2723_v59 }
 0x254   :  { %611 = vmatmul.f32.gmra.mxu3 %v2235_v30 }
 0x255   :  { %846 = vmatpush.msra.mxu3 %v2728_v56 }
 0x256   :  { %697 = vmatmul.f32.gmra.mxu2 %v2247_v31 }
 0x257   :  { %847 = vmatpush.msra.mxu3 %v2733_v52 }
 0x259   :  { %848 = vmatpush.msra.mxu3 %v2738_v49 }
 0x25b   :  { %849 = vmatpush.msra.mxu3 %v2743_v46 }
 0x25c   :  { %614 = vmatmul.f32.gmra.mxu3 %v2236_v35 }
 0x25d   :  { %850 = vmatpush.msra.mxu3 %v2748_v43 }
 0x25f   :  { %851 = vmatpush.msra.mxu3 %v2753_v39 }
 0x261   :  { %852 = vmatpush.msra.mxu3 %v2758_v36 }
 0x263   :  { %853 = vmatpush.msra.mxu3 %v2763_v34 }
 0x287   :  { %v2964_v37 = vpop.f32.mrf.mxu3 }
 0x28f   :  { %v2966_v38 = vpop.f32.mrf.mxu3 }
 0x297   :  { %v2968_v32 = vpop.f32.mrf.mxu3 }
 0x29f   :  { %v2970_v40 = vpop.f32.mrf.mxu3 }
 0x2a1   :  { %v2972_v33 = vpop.f32.mrf.mxu2 }
 0x2a7   :  { %v2974_v41 = vpop.f32.mrf.mxu3 }
 0x2a8   :  { %v490_v3 = vadd.f32 %v2974_v41, %v2964_v37 }
 0x2a9   :  { %v2976_v42 = vpop.f32.mrf.mxu2 }
 0x2aa   :  { %v580_v7 = vadd.f32 %v2972_v33, %v490_v3 }
 0x2af   :  { %v2978_v44 = vpop.f32.mrf.mxu3 }
 0x2b0   :  { %v493_v13 = vadd.f32 %v2978_v44, %v2966_v38  ;;  %v2283_v38 = vld [vmem:[%s3488_s2 + $0xb8] sm:$0xff]  ;;  %v2294_v44 = vld [vmem:[%s3488_s2 + $0xd0] sm:$0xff] }
 0x2b1   :  { %v2980_v45 = vpop.f32.mrf.mxu2  ;;  %979 = vmatpush.msra.mxu2 %v2283_v38 }
 0x2b2   :  { %v581_v16 = vadd.f32 %v2976_v42, %v493_v13  ;;  %v2281_v42 = vld [vmem:[%s3488_s2 + $0xa8] sm:$0xff] }
 0x2b7   :  { %v2982_v47 = vpop.f32.mrf.mxu3 }
 0x2b8   :  { %v496_v21 = vadd.f32 %v2982_v47, %v2968_v32  ;;  %v2282_v32 = vld [vmem:[%s3488_s2 + $0xb0] sm:$0xff] }
 0x2b9   :  { %v2984_v48 = vpop.f32.mrf.mxu2  ;;  %980 = vmatpush.msra.mxu2 %v2282_v32 }
 0x2ba   :  { %v582_v23 = vadd.f32 %v2980_v45, %v496_v21  ;;  %v2293_v45 = vld [vmem:[%s3488_s2 + $0xc8] sm:$0xff] }
 0x2bb   :  { %981 = vmatpush.msra.mxu2 %v2281_v42 }
 0x2bf   :  { %v2986_v50 = vpop.f32.mrf.mxu3 }
 0x2c0   :  { %v499_v28 = vadd.f32 %v2986_v50, %v2970_v40  ;;  %v2292_v50 = vld [vmem:[%s3488_s2 + $0xc0] sm:$0xff] }
 0x2c1   :  { %v689_v51 = vpop.f32.mrf.mxu2 }
 0x2c2   :  { %2251 = vmatmul.msk.f32.vlgmr.msrb.gmra.mxu3 %vm186_vm1, %v689_v51  ;;  %v583_v30 = vadd.f32 %v2984_v48, %v499_v28 }
 0x2c3   :  { %1004 = vmatpush.msrb.mxu3 %v2688_v17 }
 0x2c5   :  { %1005 = vmatpush.msrb.mxu3 %v2693_v19 }
 0x2c7   :  { %1006 = vmatpush.msrb.mxu3 %v2698_v25  ;;  %v606_v53 = vpop.f32.mrf.mxu3 }
 0x2c8   :  { %2240 = vmatmul.msk.f32.vlgmr.msra.gmra.mxu1 %vm186_vm1, %v606_v53 }
 0x2c9   :  { %921 = vmatpush.msra.mxu1 %v2688_v17  ;;  %1007 = vmatpush.msrb.mxu3 %v2703_v8  ;;  %v692_v54 = vpop.f32.mrf.mxu2 }
 0x2ca   :  { %2252 = vmatmul.msk.f32.gmra.mxu3 %vm186_vm1, %v692_v54 }
 0x2cb   :  { %922 = vmatpush.msra.mxu1 %v2693_v19  ;;  %1008 = vmatpush.msrb.mxu3 %v2708_v5 }
 0x2cd   :  { %923 = vmatpush.msra.mxu1 %v2698_v25  ;;  %1009 = vmatpush.msrb.mxu3 %v2713_v1 }
 0x2cf   :  { %924 = vmatpush.msra.mxu1 %v2703_v8  ;;  %1010 = vmatpush.msrb.mxu3 %v2718_v62  ;;  %v609_v55 = vpop.f32.mrf.mxu3 }
 0x2d0   :  { %2241 = vmatmul.msk.f32.gmra.mxu1 %vm186_vm1, %v609_v55 }
 0x2d1   :  { %925 = vmatpush.msra.mxu1 %v2708_v5  ;;  %1011 = vmatpush.msrb.mxu3 %v2723_v59  ;;  %v695_v17 = vpop.f32.mrf.mxu2  ;;  %v2266_v5 = vld [vmem:[%s3493_s7 + $0xc0] sm:$0xff] }
 0x2d2   :  { %2253 = vmatmul.msk.f32.gmra.mxu3 %vm186_vm1, %v695_v17 }
 0x2d3   :  { %926 = vmatpush.msra.mxu1 %v2713_v1  ;;  %1012 = vmatpush.msrb.mxu3 %v2728_v56  ;;  %v2272_v1 = vld [vmem:[%s3488_s2 + $0xa0] sm:$0xff] }
 0x2d4   :  { %896 = vmatpush.msrb.mxu0 %v2272_v1 }
 0x2d5   :  { %927 = vmatpush.msra.mxu1 %v2718_v62  ;;  %1013 = vmatpush.msrb.mxu3 %v2733_v52  ;;  %v2255_v62 = vld [vmem:[%s3493_s7 + $0xa0] sm:$0xff] }
 0x2d7   :  { %928 = vmatpush.msra.mxu1 %v2723_v59  ;;  %1014 = vmatpush.msrb.mxu3 %v2738_v49  ;;  %v612_v19 = vpop.f32.mrf.mxu3  ;;  %v2267_v59 = vld [vmem:[%s3493_s7 + $0xc8] sm:$0xff] }
 0x2d8   :  { %2242 = vmatmul.msk.f32.gmra.mxu1 %vm186_vm1, %v612_v19 }
 0x2d9   :  { %929 = vmatpush.msra.mxu1 %v2728_v56  ;;  %1015 = vmatpush.msrb.mxu3 %v2743_v46  ;;  %v698_v25 = vpop.f32.mrf.mxu2  ;;  %v2256_v56 = vld [vmem:[%s3493_s7 + $0xa8] sm:$0xff] }
 0x2da   :  { %2254 = vmatmul.msk.f32.gmra.mxu3 %vm186_vm1, %v698_v25 }
 0x2db   :  { %930 = vmatpush.msra.mxu1 %v2733_v52  ;;  %1016 = vmatpush.msrb.mxu3 %v2748_v43  ;;  %v2268_v52 = vld [vmem:[%s3493_s7 + $0xd0] sm:$0xff] }
 0x2dd   :  { %931 = vmatpush.msra.mxu1 %v2738_v49  ;;  %1017 = vmatpush.msrb.mxu3 %v2753_v39  ;;  %v2257_v49 = vld [vmem:[%s3493_s7 + $0xb0] sm:$0xff] }
 0x2df   :  { %932 = vmatpush.msra.mxu1 %v2743_v46  ;;  %1018 = vmatpush.msrb.mxu3 %v2758_v36  ;;  %v615_v8 = vpop.f32.mrf.mxu3  ;;  %v2269_v46 = vld [vmem:[%s3493_s7 + $0xd8] sm:$0xff] }
 0x2e0   :  { %2243 = vmatmul.msk.f32.gmra.mxu1 %vm186_vm1, %v615_v8 }
 0x2e1   :  { %933 = vmatpush.msra.mxu1 %v2748_v43  ;;  %1019 = vmatpush.msrb.mxu3 %v2763_v34  ;;  %v2258_v43 = vld [vmem:[%s3493_s7 + $0xb8] sm:$0xff] }
 0x2e2   :  { %854 = vmatmul.f32.vlgmr.msra.gmra.mxu3 %v2266_v5 }
 0x2e3   :  { %934 = vmatpush.msra.mxu1 %v2753_v39  ;;  %v2288_v39 = vld [vmem:[%s3493_s7 + $0x100] sm:$0xff] }
 0x2e5   :  { %935 = vmatpush.msra.mxu1 %v2758_v36  ;;  %v2271_v36 = vld [vmem:[%s3488_s2 + $0x98] sm:$0xff] }
 0x2e6   :  { %897 = vmatpush.msrb.mxu0 %v2271_v36 }
 0x2e7   :  { %936 = vmatpush.msra.mxu1 %v2763_v34  ;;  %v2277_v34 = vld [vmem:[%s3493_s7 + $0xe0] sm:$0xff] }
 0x2e8   :  { %771 = vmatmul.f32.vlgmr.msrb.gmra.mxu1 %v2255_v62  ;;  %898 = vmatpush.msrb.mxu0 %v2270_v2 }
 0x2ea   :  { %857 = vmatmul.f32.gmra.mxu3 %v2267_v59  ;;  %1062 = vmatpush.msra.mxu0 %v2294_v44 }
 0x2ec   :  { %1063 = vmatpush.msra.mxu0 %v2293_v45 }
 0x2ee   :  { %1064 = vmatpush.msra.mxu0 %v2292_v50 }
 0x2f0   :  { %774 = vmatmul.f32.gmra.mxu1 %v2256_v56 }
 0x2f2   :  { %860 = vmatmul.f32.gmra.mxu3 %v2268_v52 }
 0x2f8   :  { %777 = vmatmul.f32.gmra.mxu1 %v2257_v49 }
 0x2fa   :  { %863 = vmatmul.f32.gmra.mxu3 %v2269_v46 }
 0x300   :  { %780 = vmatmul.f32.gmra.mxu1 %v2258_v43 }
 0x302   :  { %1020 = vmatmul.f32.vlgmr.msrb.gmra.mxu3 %v2288_v39 }
 0x308   :  { %937 = vmatmul.f32.vlgmr.msra.gmra.mxu1 %v2277_v34 }
 0x30a   :  { %1023 = vmatmul.f32.gmra.mxu3 %v2289_v57 }
 0x310   :  { %940 = vmatmul.f32.gmra.mxu1 %v2278_v58 }
 0x312   :  { %1026 = vmatmul.f32.gmra.mxu3 %v2290_v60 }
 0x318   :  { %943 = vmatmul.f32.gmra.mxu1 %v2279_v61 }
 0x31a   :  { %1029 = vmatmul.f32.gmra.mxu3 %v2291_v63 }
 0x320   :  { %946 = vmatmul.f32.gmra.mxu1 %v2280_v0 }
 0x345   :  { %v651_v9 = vpop.f32.mrf.mxu1  ;;  %v734_v10 = vpop.f32.mrf.mxu3 }
 0x346   :  { %v663_v12 = vadd.f32 %v651_v9, %v580_v7 }
 0x348   :  { %v3099_v14 = vadd.f32 %v734_v10, %v663_v12 }
 0x34d   :  { %v654_v18 = vpop.f32.mrf.mxu1  ;;  %v737_v20 = vpop.f32.mrf.mxu3 }
 0x34e   :  { %v664_v15 = vadd.f32 %v654_v18, %v581_v16 }
 0x350   :  { %v3104_v22 = vadd.f32 %v737_v20, %v664_v15 }
 0x355   :  { %v657_v24 = vpop.f32.mrf.mxu1  ;;  %v740_v26 = vpop.f32.mrf.mxu3 }
 0x356   :  { %v665_v27 = vadd.f32 %v657_v24, %v582_v23 }
 0x358   :  { %v3109_v29 = vadd.f32 %v740_v26, %v665_v27 }
 0x35d   :  { %v660_v31 = vpop.f32.mrf.mxu1  ;;  %v743_v35 = vpop.f32.mrf.mxu3 }
 0x35e   :  { %v666_v37 = vadd.f32 %v660_v31, %v583_v30 }
 0x360   :  { %v3118_v33 = vadd.f32 %v743_v35, %v666_v37 }
 0x365   :  { %v772_v40 = vpop.f32.mrf.mxu1  ;;  %v855_v41 = vpop.f32.mrf.mxu3 }
 0x366   :  { %2262 = vmatmul.msk.f32.vlgmr.msrb.gmra.mxu2 %vm186_vm1, %v772_v40  ;;  %2273 = vmatmul.msk.f32.vlgmr.msrb.gmra.mxu0 %vm186_vm1, %v855_v41 }
 0x36d   :  { %v775_v47 = vpop.f32.mrf.mxu1  ;;  %v858_v48 = vpop.f32.mrf.mxu3 }
 0x36e   :  { %2263 = vmatmul.msk.f32.gmra.mxu2 %vm186_vm1, %v775_v47  ;;  %2274 = vmatmul.msk.f32.gmra.mxu0 %vm186_vm1, %v858_v48 }
 0x375   :  { %v778_v51 = vpop.f32.mrf.mxu1  ;;  %v861_v53 = vpop.f32.mrf.mxu3 }
 0x376   :  { %2264 = vmatmul.msk.f32.gmra.mxu2 %vm186_vm1, %v778_v51  ;;  %2275 = vmatmul.msk.f32.gmra.mxu0 %vm186_vm1, %v861_v53 }
 0x37d   :  { %v781_v54 = vpop.f32.mrf.mxu1  ;;  %v864_v55 = vpop.f32.mrf.mxu3 }
 0x37e   :  { %2265 = vmatmul.msk.f32.gmra.mxu2 %vm186_vm1, %v781_v54  ;;  %2276 = vmatmul.msk.f32.gmra.mxu0 %vm186_vm1, %v864_v55 }
 0x385   :  { %v938_v17 = vpop.f32.mrf.mxu1  ;;  %v1021_v19 = vpop.f32.mrf.mxu3 }
 0x386   :  { %2284 = vmatmul.msk.f32.vlgmr.msra.gmra.mxu2 %vm186_vm1, %v938_v17  ;;  %2295 = vmatmul.msk.f32.vlgmr.msra.gmra.mxu0 %vm186_vm1, %v1021_v19 }
 0x38d   :  { %v941_v25 = vpop.f32.mrf.mxu1  ;;  %v1024_v8 = vpop.f32.mrf.mxu3 }
 0x38e   :  { %2285 = vmatmul.msk.f32.gmra.mxu2 %vm186_vm1, %v941_v25  ;;  %2296 = vmatmul.msk.f32.gmra.mxu0 %vm186_vm1, %v1024_v8 }
 0x395   :  { %v944_v5 = vpop.f32.mrf.mxu1  ;;  %v1027_v1 = vpop.f32.mrf.mxu3 }
 0x396   :  { %2286 = vmatmul.msk.f32.gmra.mxu2 %vm186_vm1, %v944_v5  ;;  %2297 = vmatmul.msk.f32.gmra.mxu0 %vm186_vm1, %v1027_v1 }
 0x39d   :  { %v947_v62 = vpop.f32.mrf.mxu1  ;;  %v1030_v59 = vpop.f32.mrf.mxu3 }
 0x39e   :  { %2287 = vmatmul.msk.f32.gmra.mxu2 %vm186_vm1, %v947_v62  ;;  %2298 = vmatmul.msk.f32.gmra.mxu0 %vm186_vm1, %v1030_v59 }
 0x3e3   :  { %v900_v56 = vpop.f32.mrf.mxu0 }
 0x3e9   :  { %v817_v52 = vpop.f32.mrf.mxu2 }
 0x3ea   :  { %v829_v0 = vadd.f32 %v817_v52, %v3099_v14 }
 0x3eb   :  { %v903_v49 = vpop.f32.mrf.mxu0 }
 0x3ec   :  { %v912_v4 = vadd.f32 %v900_v56, %v829_v0 }
 0x3f1   :  { %v820_v46 = vpop.f32.mrf.mxu2 }
 0x3f2   :  { %v830_v61 = vadd.f32 %v820_v46, %v3104_v22 }
 0x3f3   :  { %v906_v43 = vpop.f32.mrf.mxu0 }
 0x3f4   :  { %v913_v2 = vadd.f32 %v903_v49, %v830_v61 }
 0x3f9   :  { %v823_v39 = vpop.f32.mrf.mxu2 }
 0x3fa   :  { %v831_v3 = vadd.f32 %v823_v39, %v3109_v29 }
 0x3fb   :  { %v909_v36 = vpop.f32.mrf.mxu0 }
 0x3fc   :  { %v914_v9 = vadd.f32 %v906_v43, %v831_v3 }
 0x401   :  { %v826_v34 = vpop.f32.mrf.mxu2 }
 0x402   :  { %v832_v16 = vadd.f32 %v826_v34, %v3118_v33  ;;  %v2304_v34 = vld [vmem:[%s3489_s3 + $0x28] sm:$0xff] }
 0x403   :  { %v1066_v57 = vpop.f32.mrf.mxu0  ;;  %1220 = vmatpush.msra.mxu3 %v2304_v34  ;;  %v2341_v34 = vld [vmem:[%s3489_s3 + $0xb8] sm:$0xff] }
 0x404   :  { %v915_v21 = vadd.f32 %v909_v36, %v832_v16 }
 0x409   :  { %v983_v58 = vpop.f32.mrf.mxu2 }
 0x40a   :  { %v995_v10 = vadd.f32 %v983_v58, %v912_v4 }
 0x40b   :  { %v1069_v60 = vpop.f32.mrf.mxu0 }
 0x40c   :  { %v1078_v18 = vadd.f32 %v1066_v57, %v995_v10  ;;  %v2303_v57 = vld [vmem:[%s3489_s3 + $0x20] sm:$0xff] }
 0x40d   :  { %1221 = vmatpush.msra.mxu3 %v2303_v57 }
 0x40e   :  { %v3154_v22 = vmax.f32 %v1078_v18, 0.0 }
 0x410   :  { %v1086_v28 = vsel %vm186_vm1, %v3154_v22, 0.0 }
 0x411   :  { %v986_v63 = vpop.f32.mrf.mxu2 }
 0x412   :  { %v996_v6 = vadd.f32 %v986_v63, %v913_v2 }
 0x413   :  { %v1072_v7 = vpop.f32.mrf.mxu0 }
 0x414   :  { %v1079_v12 = vadd.f32 %v1069_v60, %v996_v6  ;;  %v2302_v60 = vld [vmem:[%s3489_s3 + $0x18] sm:$0xff]  ;;  %v1122_v6 = vld [vmem:[%s3491_s5 + $0x1] sm:$0x1] }
 0x415   :  { %1222 = vmatpush.msra.mxu3 %v2302_v60  ;;  %v2339_v60 = vld [vmem:[%s3489_s3 + $0xa8] sm:$0xff] }
 0x416   :  { %v3152_v15 = vmax.f32 %v1079_v12, 0.0 }
 0x418   :  { %v1087_v26 = vsel %vm186_vm1, %v3152_v15, 0.0 }
 0x419   :  { %v989_v11 = vpop.f32.mrf.mxu2  ;;  %v1088_v31 = vadd.f32 %v1087_v26, %v1086_v28 }
 0x41a   :  { %v997_v13 = vadd.f32 %v989_v11, %v914_v9  ;;  %v1123_v11 = vld [vmem:[%s3492_s6 + $0x1] sm:$0x1] }
 0x41b   :  { %v1075_v24 = vpop.f32.mrf.mxu0 }
 0x41c   :  { %v1080_v20 = vadd.f32 %v1072_v7, %v997_v13 }
 0x41e   :  { %v3156_v14 = vmax.f32 %v1080_v20, 0.0 }
 0x420   :  { %v1089_v29 = vsel %vm186_vm1, %v3156_v14, 0.0 }
 0x421   :  { %v992_v23 = vpop.f32.mrf.mxu2  ;;  %v1090_v37 = vadd.f32 %v1089_v29, %v1088_v31  ;;  %v2307_v29 = vld [vmem:[%s3494_s8 + $0x10] sm:$0xff]  ;;  %v2311_v31 = vld [vmem:[%s3489_s3 + $0x40] sm:$0xff] }
 0x422   :  { %v998_v27 = vadd.f32 %v992_v23, %v915_v21 }
 0x424   :  { %v1081_v30 = vadd.f32 %v1075_v24, %v998_v27 }
 0x426   :  { %v1085_v35 = vmax.f32 %v1081_v30, 0.0  ;;  %v2319_v30 = vld [vmem:[%s3494_s8 + $0x20] sm:$0xff] }
 0x428   :  { %v1091_v38 = vsel %vm186_vm1, %v1085_v35, 0.0 }
 0x429   :  { %v1092_v32 = vadd.f32 %v1091_v38, %v1090_v37  ;;  %v1174_v37 = vld [vmem:[%s3489_s3 + $0x10] sm:$0xff] }
 0x42a   :  { %v2309_v38 = vld [vmem:[%s3489_s3 + $0x30] sm:$0xff]  ;;  %1243 = vmatpush.msrb.mxu0 %v1174_v37 }
 0x42b   :  { %v1093_v33 = vrot.slane %v1092_v32, 4 }
 0x42d   :  { %v1094_v40 = vadd.f32 %v1093_v33, %v1092_v32  ;;  %v1173_v32 = vld [vmem:[%s3489_s3 + $0x8] sm:$0xff]  ;;  %v1172_v33 = vld [vmem:[%s3489_s3] sm:$0xff] }
 0x42e   :  { %1244 = vmatpush.msrb.mxu0 %v1173_v32 }
 0x42f   :  { %v1095_v41 = vrot.slane %v1094_v40, 2 }
 0x430   :  { %1245 = vmatpush.msrb.mxu0 %v1172_v33 }
 0x431   :  { %v1096_v42 = vadd.f32 %v1095_v41, %v1094_v40  ;;  %v2331_v40 = vld [vmem:[%s3494_s8 + $0x30] sm:$0xff]  ;;  %v2343_v41 = vld [vmem:[%s3494_s8 + $0x40] sm:$0xff] }
 0x433   :  { %v1097_v44 = vrot.slane %v1096_v42, 1 }
 0x435   :  { %v1098_v45 = vadd.f32 %v1097_v44, %v1096_v42 }
 0x437   :  { %v1099_v47 = vmul.f32 0.03125, %v1098_v45 }
 0x439   :  { %v1100_v48 = vsub.f32 %v3154_v22, %v1099_v47  ;;  %v1101_v50 = vsub.f32 %v3152_v15, %v1099_v47  ;;  %v1102_v51 = vsub.f32 %v3156_v14, %v1099_v47  ;;  %v1103_v53 = vsub.f32 %v1085_v35, %v1099_v47 }
 0x43b   :  { %v1104_v54 = vmul.f32 %v1100_v48, %v1100_v48  ;;  %v1105_v55 = vmul.f32 %v1101_v50, %v1101_v50  ;;  %v1106_v17 = vmul.f32 %v1102_v51, %v1102_v51  ;;  %v1107_v19 = vmul.f32 %v1103_v53, %v1103_v53  ;;  %v2325_v48 = vld [vmem:[%s3494_s8 + $0x28] sm:$0xff]  ;;  %v2337_v50 = vld [vmem:[%s3494_s8 + $0x38] sm:$0xff]  ;;  %v2323_v51 = vld [vmem:[%s3489_s3 + $0x70] sm:$0xff] }
 0x43c   :  { %v2322_v53 = vld [vmem:[%s3489_s3 + $0x68] sm:$0xff] }
 0x43d   :  { %v1108_v25 = vsel %vm186_vm1, %v1104_v54, 0.0  ;;  %v1109_v8 = vsel %vm186_vm1, %v1105_v55, 0.0  ;;  %v1111_v1 = vsel %vm186_vm1, %v1106_v17, 0.0  ;;  %v1113_v59 = vsel %vm186_vm1, %v1107_v19, 0.0  ;;  %v2317_v54 = vld [vmem:[%s3489_s3 + $0x58] sm:$0xff]  ;;  %v2316_v17 = vld [vmem:[%s3489_s3 + $0x50] sm:$0xff] }
 0x43e   :  { %v1110_v5 = vadd.f32 %v1109_v8, %v1108_v25  ;;  %1348 = vmatpush.msra.mxu0 %v2317_v54  ;;  %v2321_v19 = vld [vmem:[%s3489_s3 + $0x60] sm:$0xff]  ;;  %v2315_v25 = vld [vmem:[%s3489_s3 + $0x48] sm:$0xff] }
 0x43f   :  { %v2335_v8 = vld [vmem:[%s3489_s3 + $0xa0] sm:$0xff] }
 0x440   :  { %v1112_v62 = vadd.f32 %v1111_v1, %v1110_v5  ;;  %1349 = vmatpush.msra.mxu0 %v2316_v17  ;;  %v2334_v5 = vld [vmem:[%s3489_s3 + $0x98] sm:$0xff]  ;;  %v2329_v1 = vld [vmem:[%s3489_s3 + $0x88] sm:$0xff] }
 0x442   :  { %v1114_v56 = vadd.f32 %v1113_v59, %v1112_v62  ;;  %1350 = vmatpush.msra.mxu0 %v2315_v25  ;;  %v2333_v62 = vld [vmem:[%s3489_s3 + $0x90] sm:$0xff]  ;;  %v2328_v59 = vld [vmem:[%s3489_s3 + $0x80] sm:$0xff] }
 0x444   :  { %v1115_v52 = vrot.slane %v1114_v56, 4 }
 0x446   :  { %v1116_v49 = vadd.f32 %v1115_v52, %v1114_v56  ;;  %v2327_v52 = vld [vmem:[%s3489_s3 + $0x78] sm:$0xff] }
 0x448   :  { %v1117_v46 = vrot.slane %v1116_v49, 2 }
 0x44a   :  { %v1118_v43 = vadd.f32 %v1117_v46, %v1116_v49  ;;  %v2347_v49 = vld [vmem:[%s3489_s3 + $0xd0] sm:$0xff]  ;;  %v2346_v46 = vld [vmem:[%s3489_s3 + $0xc8] sm:$0xff] }
 0x44c   :  { %v1119_v39 = vrot.slane %v1118_v43, 1 }
 0x44e   :  { %v1120_v36 = vadd.f32 %v1119_v39, %v1118_v43  ;;  %v2345_v43 = vld [vmem:[%s3489_s3 + $0xc0] sm:$0xff] }
 0x450   :  { %v1121_v58 = vmul.f32 0.03125, %v1120_v36 }
 0x452   :  { %v1124_v61 = vadd.f32 1e-05, %v1121_v58  ;;  %v2340_v58 = vld [vmem:[%s3489_s3 + $0xb0] sm:$0xff] }
 0x454   :  { %2402 = vrsqrt.f32 %v1124_v61  ;;  %vm1131_vm6 = vweird.f32 %v1124_v61 }
 0x45a   :  { %v2403_v63 = vpop.eup %2402 }
 0x45b   :  { %v1126_v0 = vmul.f32 %v2403_v63, %v1124_v61  ;;  %vm1132_vm5 = vweird.f32 %v2403_v63 }
 0x45c   :  { %vm1133_vm7 = vmor %vm1131_vm6, %vm1132_vm5 }
 0x45d   :  { %v1127_v2 = vmul.f32 %v2403_v63, %v1126_v0 }
 0x45f   :  { %v1128_v3 = vmul.f32 0.5, %v1127_v2 }
 0x461   :  { %v1129_v4 = vsub.f32 1.5, %v1128_v3 }
 0x463   :  { %v1130_v7 = vmul.f32 %v2403_v63, %v1129_v4 }
 0x465   :  { %v1134_v9 = vsel %vm1133_vm7, %v2403_v63, %v1130_v7 }
 0x466   :  { %v1135_v10 = vmul.f32 %v1134_v9, %v1122_v6 }
 0x468   :  { %v1136_v12 = vmul.f32 %v1135_v10, %v1099_v47  ;;  %v1138_v13 = vperm.slane %v1135_v10, 0  ;;  %v2313_v47 = vld [vmem:[%s3494_s8 + $0x18] sm:$0xff] }
 0x46a   :  { %v1137_v16 = vsub.f32 %v1123_v11, %v1136_v12  ;;  %v1142_v18 = vmul.f32 %v1138_v13, %v1085_v35  ;;  %v1141_v21 = vmul.f32 %v1138_v13, %v3156_v14  ;;  %v1140_v24 = vmul.f32 %v1138_v13, %v3152_v15  ;;  %v2300_v15 = vld [vmem:[%s3494_s8 + $0x8] sm:$0xff]  ;;  %v2310_v35 = vld [vmem:[%s3489_s3 + $0x38] sm:$0xff]  ;;  %s2180_s3 = sshll.u32 %s2434_s28, 4  ;;  %s2181_s3 = int_to_ptr.vmem [resolvable:$true] %s2180_s3 }
 0x46b   :  { %v1139_v27 = vmul.f32 %v1138_v13, %v3154_v22  ;;  %v1148_v22 = vld [vmem:[%s3494_s8] sm:$0xff] }
 0x46c   :  { %v1143_v20 = vperm.slane %v1137_v16, 0 }
 0x46e   :  { %v3188_v23 = vadd.f32 %v1143_v20, %v1142_v18  ;;  %v3191_v26 = vadd.f32 %v1143_v20, %v1141_v21  ;;  %v3197_v28 = vadd.f32 %v1143_v20, %v1140_v24  ;;  %v1144_v14 = vadd.f32 %v1143_v20, %v1139_v27 }
 0x470   :  { %1164 = vmatpush.msrb.mxu1 %v3188_v23  ;;  %1192 = vmatpush.msrb.mxu2 %v3188_v23 }
 0x471   :  { %1320 = vmatpush.msrb.mxu3 %v3188_v23 }
 0x472   :  { %1165 = vmatpush.msrb.mxu1 %v3191_v26  ;;  %1193 = vmatpush.msrb.mxu2 %v3191_v26 }
 0x473   :  { %1321 = vmatpush.msrb.mxu3 %v3191_v26 }
 0x474   :  { %1166 = vmatpush.msrb.mxu1 %v3197_v28  ;;  %1194 = vmatpush.msrb.mxu2 %v3197_v28 }
 0x475   :  { %1322 = vmatpush.msrb.mxu3 %v3197_v28 }
 0x476   :  { %1167 = vmatpush.msrb.mxu1 %v1144_v14  ;;  %1195 = vmatpush.msrb.mxu2 %v1144_v14 }
 0x477   :  { %1323 = vmatpush.msrb.mxu3 %v1144_v14  ;;  %2301 = vmatmul.msk.f32.vlgmr.msrb.gmra.mxu2 %vm56_vm0, %v2300_v15 }
 0x478   :  { %1267 = vmatpush.msra.mxu1 %v3188_v23  ;;  %1295 = vmatpush.msra.mxu2 %v2311_v31 }
 0x479   :  { %2299 = vmatmul.msk.f32.vlgmr.msrb.gmra.mxu1 %vm56_vm0, %v1148_v22 }
 0x47a   :  { %1268 = vmatpush.msra.mxu1 %v3191_v26  ;;  %1296 = vmatpush.msra.mxu2 %v2310_v35 }
 0x47c   :  { %1269 = vmatpush.msra.mxu1 %v3197_v28  ;;  %1297 = vmatpush.msra.mxu2 %v2309_v38 }
 0x47e   :  { %1270 = vmatpush.msra.mxu1 %v1144_v14  ;;  %1401 = vmatpush.msrb.mxu2 %v2323_v51 }
 0x480   :  { %1373 = vmatpush.msrb.mxu1 %v3188_v23  ;;  %1402 = vmatpush.msrb.mxu2 %v2322_v53 }
 0x481   :  { %2308 = vmatmul.msk.f32.vlgmr.msra.gmra.mxu1 %vm56_vm0, %v2307_v29 }
 0x482   :  { %1374 = vmatpush.msrb.mxu1 %v3191_v26  ;;  %1403 = vmatpush.msrb.mxu2 %v2321_v19  ;;  %v1640_v19 = vld [vmem:[%s3491_s5 + $0x2] sm:$0x1] }
 0x484   :  { %1375 = vmatpush.msrb.mxu1 %v3197_v28 }
 0x486   :  { %1376 = vmatpush.msrb.mxu1 %v1144_v14 }
 0x488   :  { %1479 = vmatpush.msra.mxu1 %v3188_v23 }
 0x489   :  { %2320 = vmatmul.msk.f32.vlgmr.msrb.gmra.mxu1 %vm56_vm0, %v2319_v30 }
 0x48a   :  { %1480 = vmatpush.msra.mxu1 %v3191_v26 }
 0x48c   :  { %1481 = vmatpush.msra.mxu1 %v3197_v28 }
 0x48e   :  { %1482 = vmatpush.msra.mxu1 %v1144_v14 }
 0x490   :  { %1585 = vmatpush.msrb.mxu1 %v3188_v23 }
 0x491   :  { %2332 = vmatmul.msk.f32.vlgmr.msra.gmra.mxu1 %vm56_vm0, %v2331_v40 }
 0x492   :  { %1586 = vmatpush.msrb.mxu1 %v3191_v26 }
 0x494   :  { %1587 = vmatpush.msrb.mxu1 %v3197_v28 }
 0x496   :  { %1588 = vmatpush.msrb.mxu1 %v1144_v14 }
 0x499   :  { %2344 = vmatmul.msk.f32.vlgmr.msrb.gmra.mxu1 %vm56_vm0, %v2343_v41 }
 0x4f6   :  { %v1169_v42 = vpop.f32.mrf.mxu1 }
 0x4f7   :  { %2306 = vmatmul.msk.f32.vlgmr.msrb.gmra.mxu0 %vm186_vm1, %v1169_v42 }
 0x4f8   :  { %1454 = vmatpush.msrb.mxu0 %v2329_v1  ;;  %v1641_v1 = vld [vmem:[%s3492_s6 + $0x2] sm:$0x1] }
 0x4fa   :  { %v1197_v44 = vpop.f32.mrf.mxu2  ;;  %1455 = vmatpush.msrb.mxu0 %v2328_v59 }
 0x4fb   :  { %2305 = vmatmul.msk.f32.vlgmr.msra.gmra.mxu3 %vm186_vm1, %v1197_v44  ;;  %v2354_v44 = vld [vmem:[%s3490_s4 + $0x28] sm:$0xff] }
 0x4fc   :  { %1426 = vmatpush.msra.mxu3 %v3188_v23  ;;  %1456 = vmatpush.msrb.mxu0 %v2327_v52 }
 0x4fd   :  { %1733 = vmatpush.msra.mxu1 %v2354_v44 }
 0x4fe   :  { %1427 = vmatpush.msra.mxu3 %v3191_v26  ;;  %v1272_v45 = vpop.f32.mrf.mxu1 }
 0x4ff   :  { %2312 = vmatmul.msk.f32.vlgmr.msra.gmra.mxu2 %vm186_vm1, %v1272_v45  ;;  %v2353_v45 = vld [vmem:[%s3490_s4 + $0x20] sm:$0xff] }
 0x500   :  { %1428 = vmatpush.msra.mxu3 %v3197_v28  ;;  %1507 = vmatpush.msra.mxu2 %v2335_v8 }
 0x501   :  { %1734 = vmatpush.msra.mxu1 %v2353_v45 }
 0x502   :  { %1429 = vmatpush.msra.mxu3 %v1144_v14  ;;  %1508 = vmatpush.msra.mxu2 %v2334_v5 }
 0x503   :  { %2314 = vmatmul.msk.f32.vlgmr.msrb.gmra.mxu3 %vm56_vm0, %v2313_v47 }
 0x504   :  { %1532 = vmatpush.msrb.mxu3 %v3188_v23  ;;  %1509 = vmatpush.msra.mxu2 %v2333_v62 }
 0x506   :  { %1533 = vmatpush.msrb.mxu3 %v3191_v26  ;;  %v1378_v55 = vpop.f32.mrf.mxu1 }
 0x507   :  { %2324 = vmatmul.msk.f32.vlgmr.msrb.gmra.mxu2 %vm186_vm1, %v1378_v55 }
 0x508   :  { %1534 = vmatpush.msrb.mxu3 %v3197_v28  ;;  %1613 = vmatpush.msrb.mxu2 %v2347_v49 }
 0x50a   :  { %1535 = vmatpush.msrb.mxu3 %v1144_v14  ;;  %1614 = vmatpush.msrb.mxu2 %v2346_v46 }
 0x50b   :  { %2326 = vmatmul.msk.f32.vlgmr.msra.gmra.mxu3 %vm56_vm0, %v2325_v48  ;;  %v2352_v48 = vld [vmem:[%s3490_s4 + $0x18] sm:$0xff] }
 0x50c   :  { %1615 = vmatpush.msrb.mxu2 %v2345_v43  ;;  %1735 = vmatpush.msra.mxu1 %v2352_v48  ;;  %v1660_v43 = vld [vmem:[%s3495_s9] sm:$0x3] }
 0x50e   :  { %v1484_v56 = vpop.f32.mrf.mxu1 }
 0x50f   :  { %2336 = vmatmul.msk.f32.vlgmr.msra.gmra.mxu2 %vm186_vm1, %v1484_v56 }
 0x513   :  { %2338 = vmatmul.msk.f32.vlgmr.msrb.gmra.mxu3 %vm56_vm0, %v2337_v50 }
 0x516   :  { %v1590_v39 = vpop.f32.mrf.mxu1 }
 0x517   :  { %2348 = vmatmul.msk.f32.vlgmr.msrb.gmra.mxu2 %vm186_vm1, %v1590_v39  ;;  %v2350_v39 = vld [vmem:[%s3495_s9 + $0x2] sm:$0x3] }
 0x574   :  { %v1247_v2 = vpop.f32.mrf.mxu0 }
 0x57e   :  { %v1224_v36 = vpop.f32.mrf.mxu3 }
 0x57f   :  { %v1248_v4 = vadd.f32 %v1247_v2, %v1224_v36  ;;  %v2357_v36 = vld [vmem:[%s3495_s9 + $0x4] sm:$0x3]  ;;  %v2359_v2 = vld [vmem:[%s3490_s4 + $0x30] sm:$0xff] }
 0x582   :  { %v1299_v0 = vpop.f32.mrf.mxu2 }
 0x583   :  { %v1302_v7 = vadd.f32 %v1299_v0, %v1248_v4  ;;  %v2360_v0 = vld [vmem:[%s3490_s4 + $0x38] sm:$0xff] }
 0x586   :  { %v1325_v57 = vpop.f32.mrf.mxu3 }
 0x587   :  { %2318 = vmatmul.msk.f32.vlgmr.msra.gmra.mxu0 %vm186_vm1, %v1325_v57  ;;  %v1687_v57 = vld [vmem:[%s3490_s4 + $0x10] sm:$0xff] }
 0x588   :  { %1560 = vmatpush.msra.mxu0 %v2341_v34  ;;  %v2369_v34 = vld [vmem:[%s3495_s9 + $0x8] sm:$0x3]  ;;  %1756 = vmatpush.msra.mxu2 %v1687_v57 }
 0x58a   :  { %1561 = vmatpush.msra.mxu0 %v2340_v58  ;;  %v1405_v3 = vpop.f32.mrf.mxu2  ;;  %v1686_v58 = vld [vmem:[%s3490_s4 + $0x8] sm:$0xff] }
 0x58b   :  { %1757 = vmatpush.msra.mxu2 %v1686_v58 }
 0x58c   :  { %1562 = vmatpush.msra.mxu0 %v2339_v60  ;;  %v1685_v60 = vld [vmem:[%s3490_s4] sm:$0xff] }
 0x58d   :  { %1758 = vmatpush.msra.mxu2 %v1685_v60 }
 0x58e   :  { %v1431_v61 = vpop.f32.mrf.mxu3 }
 0x58f   :  { %2330 = vmatmul.msk.f32.vlgmr.msrb.gmra.mxu0 %vm186_vm1, %v1431_v61  ;;  %v2361_v61 = vld [vmem:[%s3490_s4 + $0x40] sm:$0xff] }
 0x592   :  { %v1511_v10 = vpop.f32.mrf.mxu2 }
 0x596   :  { %v1537_v63 = vpop.f32.mrf.mxu3 }
 0x597   :  { %2342 = vmatmul.msk.f32.vlgmr.msra.gmra.mxu0 %vm186_vm1, %v1537_v63  ;;  %v2381_v63 = vld [vmem:[%s3495_s9 + $0xc] sm:$0x3] }
 0x59a   :  { %v1617_v20 = vpop.f32.mrf.mxu2 }
 0x604   :  { %v1352_v6 = vpop.f32.mrf.mxu0 }
 0x605   :  { %v1355_v9 = vadd.f32 %v1352_v6, %v1302_v7  ;;  %v2363_v7 = vld [vmem:[%s3495_s9 + $0x6] sm:$0x3] }
 0x607   :  { %v1408_v12 = vadd.f32 %v1405_v3, %v1355_v9  ;;  %v2393_v3 = vld [vmem:[%s3495_s9 + $0x10] sm:$0x3] }
 0x60c   :  { %v1458_v11 = vpop.f32.mrf.mxu0 }
 0x60d   :  { %v1461_v13 = vadd.f32 %v1458_v11, %v1408_v12  ;;  %v2387_v11 = vld [vmem:[%s3495_s9 + $0xe] sm:$0x3]  ;;  %v2367_v12 = vld [vmem:[%s3490_s4 + $0x58] sm:$0xff] }
 0x60e   :  { %1861 = vmatpush.msrb.mxu2 %v2367_v12 }
 0x60f   :  { %v1514_v16 = vadd.f32 %v1511_v10, %v1461_v13  ;;  %v2375_v10 = vld [vmem:[%s3495_s9 + $0xa] sm:$0x3]  ;;  %v2366_v13 = vld [vmem:[%s3490_s4 + $0x50] sm:$0xff] }
 0x610   :  { %1862 = vmatpush.msrb.mxu2 %v2366_v13 }
 0x614   :  { %v1564_v18 = vpop.f32.mrf.mxu0 }
 0x615   :  { %v1567_v21 = vadd.f32 %v1564_v18, %v1514_v16  ;;  %v2365_v16 = vld [vmem:[%s3490_s4 + $0x48] sm:$0xff]  ;;  %v2373_v18 = vld [vmem:[%s3490_s4 + $0x70] sm:$0xff] }
 0x616   :  { %1863 = vmatpush.msrb.mxu2 %v2365_v16  ;;  %v2154_v16 = vld [vmem:[%s3491_s5 + $0x3] sm:$0x1] }
 0x617   :  { %v1620_v23 = vadd.f32 %v1617_v20, %v1567_v21  ;;  %v2379_v20 = vld [vmem:[%s3490_s4 + $0x88] sm:$0xff] }
 0x618   :  { %v2372_v21 = vld [vmem:[%s3490_s4 + $0x68] sm:$0xff] }
 0x619   :  { %v1621_v24 = vmax.f32 %v1620_v23, 0.0  ;;  %v2378_v23 = vld [vmem:[%s3490_s4 + $0x80] sm:$0xff] }
 0x61b   :  { %v1622_v26 = vsel %vm186_vm1, %v1621_v24, 0.0 }
 0x61c   :  { %v1623_v27 = vrot.slane %v1622_v26, 4 }
 0x61e   :  { %v1624_v28 = vadd.f32 %v1623_v27, %v1622_v26  ;;  %v2377_v27 = vld [vmem:[%s3490_s4 + $0x78] sm:$0xff] }
 0x620   :  { %v1625_v14 = vrot.slane %v1624_v28, 2 }
 0x622   :  { %v1626_v15 = vadd.f32 %v1625_v14, %v1624_v28  ;;  %v2385_v28 = vld [vmem:[%s3490_s4 + $0xa0] sm:$0xff]  ;;  %v2384_v14 = vld [vmem:[%s3490_s4 + $0x98] sm:$0xff] }
 0x624   :  { %v1627_v22 = vrot.slane %v1626_v15, 1 }
 0x626   :  { %v1628_v29 = vadd.f32 %v1627_v22, %v1626_v15  ;;  %v2383_v15 = vld [vmem:[%s3490_s4 + $0x90] sm:$0xff] }
 0x628   :  { %v1629_v30 = vmul.f32 0.125, %v1628_v29  ;;  %v2397_v29 = vld [vmem:[%s3490_s4 + $0xd0] sm:$0xff] }
 0x62a   :  { %v1630_v31 = vsub.f32 %v1621_v24, %v1629_v30 }
 0x62c   :  { %v1631_v35 = vmul.f32 %v1630_v31, %v1630_v31  ;;  %v2395_v31 = vld [vmem:[%s3490_s4 + $0xc0] sm:$0xff] }
 0x62e   :  { %v1632_v37 = vsel %vm186_vm1, %v1631_v35, 0.0 }
 0x62f   :  { %v1633_v38 = vrot.slane %v1632_v37, 4 }
 0x631   :  { %v1634_v32 = vadd.f32 %v1633_v38, %v1632_v37  ;;  %v2391_v38 = vld [vmem:[%s3490_s4 + $0xb8] sm:$0xff] }
 0x633   :  { %v1635_v33 = vrot.slane %v1634_v32, 2 }
 0x635   :  { %v1636_v40 = vadd.f32 %v1635_v33, %v1634_v32  ;;  %v2390_v33 = vld [vmem:[%s3490_s4 + $0xb0] sm:$0xff] }
 0x637   :  { %v1637_v41 = vrot.slane %v1636_v40, 1 }
 0x639   :  { %v1638_v42 = vadd.f32 %v1637_v41, %v1636_v40  ;;  %v2389_v40 = vld [vmem:[%s3490_s4 + $0xa8] sm:$0xff] }
 0x63b   :  { %v1639_v47 = vmul.f32 0.125, %v1638_v42 }
 0x63d   :  { %v1642_v50 = vadd.f32 1e-05, %v1639_v47 }
 0x63f   :  { %2404 = vrsqrt.f32 %v1642_v50  ;;  %vm1649_vm9 = vweird.f32 %v1642_v50 }
 0x645   :  { %v2405_v51 = vpop.eup %2404 }
 0x646   :  { %v1644_v53 = vmul.f32 %v2405_v51, %v1642_v50  ;;  %vm1650_vm8 = vweird.f32 %v2405_v51 }
 0x647   :  { %vm1651_vm10 = vmor %vm1649_vm9, %vm1650_vm8 }
 0x648   :  { %v1645_v54 = vmul.f32 %v2405_v51, %v1644_v53 }
 0x64a   :  { %v1646_v55 = vmul.f32 0.5, %v1645_v54 }
 0x64c   :  { %v1647_v17 = vsub.f32 1.5, %v1646_v55 }
 0x64e   :  { %v1648_v25 = vmul.f32 %v2405_v51, %v1647_v17 }
 0x650   :  { %v1652_v8 = vsel %vm1651_vm10, %v2405_v51, %v1648_v25 }
 0x651   :  { %v1653_v5 = vmul.f32 %v1652_v8, %v1640_v19 }
 0x653   :  { %v1654_v62 = vmul.f32 %v1653_v5, %v1629_v30  ;;  %v1656_v59 = vperm.slane %v1653_v5, 0  ;;  %v2396_v30 = vld [vmem:[%s3490_s4 + $0xc8] sm:$0xff] }
 0x655   :  { %v1655_v56 = vsub.f32 %v1641_v1, %v1654_v62  ;;  %v1657_v52 = vmul.f32 %v1656_v59, %v1621_v24  ;;  %v2371_v24 = vld [vmem:[%s3490_s4 + $0x60] sm:$0xff] }
 0x657   :  { %v1658_v49 = vperm.slane %v1655_v56, 0 }
 0x659   :  { %v1659_v46 = vadd.f32 %v1658_v49, %v1657_v52 }
 0x65b   :  { %1680 = vmatpush.msra.mxu3 %v1659_v46  ;;  %1708 = vmatpush.msrb.mxu0 %v1659_v46 }
 0x65c   :  { %1836 = vmatpush.msrb.mxu1 %v1659_v46  ;;  %2349 = vmatmul.msk.f32.vlgmr.msra.gmra.mxu3 %vm1661_vm11, %v1660_v43 }
 0x65d   :  { %2351 = vmatmul.msk.f32.vlgmr.msrb.gmra.mxu0 %vm1661_vm11, %v2350_v39  ;;  %1783 = vmatpush.msrb.mxu3 %v1659_v46 }
 0x65e   :  { %1808 = vmatpush.msra.mxu0 %v2361_v61 }
 0x65f   :  { %1889 = vmatpush.msra.mxu3 %v1659_v46 }
 0x660   :  { %1809 = vmatpush.msra.mxu0 %v2360_v0 }
 0x662   :  { %1810 = vmatpush.msra.mxu0 %v2359_v2 }
 0x664   :  { %2358 = vmatmul.msk.f32.vlgmr.msrb.gmra.mxu3 %vm1661_vm11, %v2357_v36  ;;  %1914 = vmatpush.msrb.mxu0 %v2373_v18 }
 0x665   :  { %1995 = vmatpush.msrb.mxu3 %v1659_v46 }
 0x666   :  { %1915 = vmatpush.msrb.mxu0 %v2372_v21 }
 0x668   :  { %1916 = vmatpush.msrb.mxu0 %v2371_v24 }
 0x66c   :  { %2370 = vmatmul.msk.f32.vlgmr.msra.gmra.mxu3 %vm1661_vm11, %v2369_v34 }
 0x66d   :  { %2101 = vmatpush.msra.mxu3 %v1659_v46 }
 0x674   :  { %2382 = vmatmul.msk.f32.vlgmr.msrb.gmra.mxu3 %vm1661_vm11, %v2381_v63 }
 0x67c   :  { %2394 = vmatmul.msk.f32.vlgmr.msra.gmra.mxu3 %vm1661_vm11, %v2393_v3 }
 0x6da   :  { %v1710_v4 = vpop.f32.mrf.mxu0 }
 0x6db   :  { %2355 = vmatmul.msk.f32.vlgmr.msra.gmra.mxu1 %vm186_vm1, %v1710_v4 }
 0x6dc   :  { %1942 = vmatpush.msra.mxu1 %v1659_v46 }
 0x6df   :  { %v1682_v6 = vpop.f32.mrf.mxu3 }
 0x6e0   :  { %2356 = vmatmul.msk.f32.vlgmr.msra.gmra.mxu2 %vm186_vm1, %v1682_v6 }
 0x6e1   :  { %1967 = vmatpush.msra.mxu2 %v2379_v20 }
 0x6e3   :  { %2364 = vmatmul.msk.f32.vlgmr.msrb.gmra.mxu1 %vm1661_vm11, %v2363_v7  ;;  %1968 = vmatpush.msra.mxu2 %v2378_v23  ;;  %v2155_v23 = vld [vmem:[%s3492_s6 + $0x3] sm:$0x1] }
 0x6e4   :  { %2048 = vmatpush.msrb.mxu1 %v1659_v46 }
 0x6e5   :  { %1969 = vmatpush.msra.mxu2 %v2377_v27 }
 0x6e7   :  { %v1785_v9 = vpop.f32.mrf.mxu3 }
 0x6e8   :  { %2362 = vmatmul.msk.f32.vlgmr.msra.gmra.mxu0 %vm186_vm1, %v1785_v9 }
 0x6e9   :  { %2020 = vmatpush.msra.mxu0 %v2385_v28 }
 0x6eb   :  { %2376 = vmatmul.msk.f32.vlgmr.msra.gmra.mxu1 %vm1661_vm11, %v2375_v10  ;;  %2021 = vmatpush.msra.mxu0 %v2384_v14 }
 0x6ed   :  { %2022 = vmatpush.msra.mxu0 %v2383_v15 }
 0x6ef   :  { %v1891_v26 = vpop.f32.mrf.mxu3 }
 0x6f0   :  { %2374 = vmatmul.msk.f32.vlgmr.msrb.gmra.mxu0 %vm186_vm1, %v1891_v26 }
 0x6f1   :  { %2126 = vmatpush.msrb.mxu0 %v2397_v29 }
 0x6f3   :  { %2388 = vmatmul.msk.f32.vlgmr.msrb.gmra.mxu1 %vm1661_vm11, %v2387_v11  ;;  %2127 = vmatpush.msrb.mxu0 %v2396_v30 }
 0x6f5   :  { %2128 = vmatpush.msrb.mxu0 %v2395_v31 }
 0x6f7   :  { %v1997_v22 = vpop.f32.mrf.mxu3 }
 0x6f8   :  { %2386 = vmatmul.msk.f32.vlgmr.msra.gmra.mxu0 %vm186_vm1, %v1997_v22 }
 0x6ff   :  { %v2103_v35 = vpop.f32.mrf.mxu3 }
 0x700   :  { %2398 = vmatmul.msk.f32.vlgmr.msrb.gmra.mxu0 %vm186_vm1, %v2103_v35 }
 0x758   :  { %v1737_v37 = vpop.f32.mrf.mxu1 }
 0x760   :  { %v1838_v32 = vpop.f32.mrf.mxu1 }
 0x761   :  { %2368 = vmatmul.msk.f32.vlgmr.msrb.gmra.mxu2 %vm186_vm1, %v1838_v32 }
 0x762   :  { %2073 = vmatpush.msrb.mxu2 %v2391_v38 }
 0x763   :  { %v1760_v45 = vpop.f32.mrf.mxu2 }
 0x764   :  { %2074 = vmatpush.msrb.mxu2 %v2390_v33  ;;  %v1761_v48 = vadd.f32 %v1760_v45, %v1737_v37 }
 0x765   :  { %v1812_v44 = vpop.f32.mrf.mxu0 }
 0x766   :  { %2075 = vmatpush.msrb.mxu2 %v2389_v40  ;;  %v1815_v51 = vadd.f32 %v1812_v44, %v1761_v48 }
 0x768   :  { %v1944_v41 = vpop.f32.mrf.mxu1 }
 0x769   :  { %2380 = vmatmul.msk.f32.vlgmr.msra.gmra.mxu2 %vm186_vm1, %v1944_v41 }
 0x76d   :  { %v1918_v47 = vpop.f32.mrf.mxu0 }
 0x770   :  { %v2050_v42 = vpop.f32.mrf.mxu1 }
 0x771   :  { %2392 = vmatmul.msk.f32.vlgmr.msrb.gmra.mxu2 %vm186_vm1, %v2050_v42 }
 0x775   :  { %v2024_v54 = vpop.f32.mrf.mxu0 }
 0x77d   :  { %v2130_v5 = vpop.f32.mrf.mxu0 }
 0x7e4   :  { %v1865_v50 = vpop.f32.mrf.mxu2 }
 0x7e5   :  { %v1868_v53 = vadd.f32 %v1865_v50, %v1815_v51 }
 0x7e7   :  { %v1921_v17 = vadd.f32 %v1918_v47, %v1868_v53 }
 0x7ec   :  { %v1971_v55 = vpop.f32.mrf.mxu2 }
 0x7ed   :  { %v1974_v19 = vadd.f32 %v1971_v55, %v1921_v17 }
 0x7ef   :  { %v2027_v25 = vadd.f32 %v2024_v54, %v1974_v19 }
 0x7f4   :  { %v2077_v8 = vpop.f32.mrf.mxu2 }
 0x7f5   :  { %v2080_v1 = vadd.f32 %v2077_v8, %v2027_v25 }
 0x7f7   :  { %v2133_v62 = vadd.f32 %v2130_v5, %v2080_v1 }
 0x7f9   :  { %v2134_v59 = vmax.f32 %v2133_v62, 0.0 }
 0x7fb   :  { %v2136_v56 = vsel %vm2135_vm12, %v2134_v59, 0.0 }
 0x7fc   :  { %v2137_v52 = vrot.slane %v2136_v56, 4 }
 0x7fe   :  { %v2138_v49 = vadd.f32 %v2137_v52, %v2136_v56 }
 0x800   :  { %v2139_v46 = vrot.slane %v2138_v49, 2 }
 0x802   :  { %v2140_v43 = vadd.f32 %v2139_v46, %v2138_v49 }
 0x804   :  { %v2141_v39 = vrot.slane %v2140_v43, 1 }
 0x806   :  { %v2142_v36 = vadd.f32 %v2141_v39, %v2140_v43 }
 0x808   :  { %v2143_v34 = vmul.f32 0.5, %v2142_v36 }
 0x80a   :  { %v2144_v57 = vsub.f32 %v2134_v59, %v2143_v34 }
 0x80c   :  { %v2145_v58 = vmul.f32 %v2144_v57, %v2144_v57 }
 0x80e   :  { %v2146_v60 = vsel %vm2135_vm12, %v2145_v58, 0.0 }
 0x80f   :  { %v2147_v61 = vrot.slane %v2146_v60, 4 }
 0x811   :  { %v2148_v63 = vadd.f32 %v2147_v61, %v2146_v60 }
 0x813   :  { %v2149_v0 = vrot.slane %v2148_v63, 2 }
 0x815   :  { %v2150_v2 = vadd.f32 %v2149_v0, %v2148_v63 }
 0x817   :  { %v2151_v3 = vrot.slane %v2150_v2, 1 }
 0x819   :  { %v2152_v4 = vadd.f32 %v2151_v3, %v2150_v2 }
 0x81b   :  { %v2153_v6 = vmul.f32 0.5, %v2152_v4 }
 0x81d   :  { %v2156_v7 = vadd.f32 1e-05, %v2153_v6 }
 0x81f   :  { %2406 = vrsqrt.f32 %v2156_v7  ;;  %vm2163_vm14 = vweird.f32 %v2156_v7 }
 0x825   :  { %v2407_v9 = vpop.eup %2406 }
 0x826   :  { %v2158_v10 = vmul.f32 %v2407_v9, %v2156_v7  ;;  %vm2164_vm13 = vweird.f32 %v2407_v9 }
 0x827   :  { %vm2165_vm15 = vmor %vm2163_vm14, %vm2164_vm13 }
 0x828   :  { %v2159_v11 = vmul.f32 %v2407_v9, %v2158_v10 }
 0x82a   :  { %v2160_v12 = vmul.f32 0.5, %v2159_v11 }
 0x82c   :  { %v2161_v13 = vsub.f32 1.5, %v2160_v12 }
 0x82e   :  { %v2162_v18 = vmul.f32 %v2407_v9, %v2161_v13 }
 0x830   :  { %v2166_v20 = vsel %vm2165_vm15, %v2407_v9, %v2162_v18 }
 0x831   :  { %v2167_v21 = vmul.f32 %v2166_v20, %v2154_v16 }
 0x833   :  { %v2168_v24 = vmul.f32 %v2167_v21, %v2143_v34  ;;  %v2170_v26 = vperm.slane %v2167_v21, 0 }
 0x835   :  { %v2169_v27 = vsub.f32 %v2155_v23, %v2168_v24  ;;  %v2171_v28 = vmul.f32 %v2170_v26, %v2134_v59 }
 0x837   :  { %v2172_v14 = vperm.slane %v2169_v27, 0 }
 0x839   :  { %v2173_v15 = vadd.f32 %v2172_v14, %v2171_v28 }
 0x83b   :  { %2174 = vst.msk [vmem:[#allocation2] sm:$0x3] %vm2135_vm12, %v2173_v15 }
 0x83c   :  { %2185 = dma.vmem_to_hbm [thread:$0]  %s2181_s3, 32, %s2183_s0, [#allocation3]  }
 0x83d   :  { %2432 = dma.done.wait [#allocation3], 32  }
 0x83e   :  { %2433 = vsyncadd [#allocation3], 4294967264 }
 0x83f   :  { %2190 = vsyncpa [#allocation3], 1 }

</bundles_post_ra>
